<compile_context>
chip_gen: v6e
topology: v6e:2x2x1
jax: 0.10.0
libtpu: 0.0.40
codegen_flags: <defaults>
</compile_context>

<pallas_src>
import functools

import jax
import jax.numpy as jnp
from jax import lax
from jax.experimental import pallas as pl
from jax.experimental.pallas import tpu as pltpu


# ----------------------------------------------------------------------------
# Fused kernel: (conv3x3x3 + folded-BN + ReLU) * num_layers  ->  maxpool 2x2x2
# One grid step == one sample; all activations live in VMEM with (W, C) fused
# onto the lane dimension.
# ----------------------------------------------------------------------------
def _make_fused_kernel(num_layers, d, h, w, cins, cout, pool):
    dh = d * h
    wp = w + 2                      # padded W extent
    do, ho, wo = d // 2, h // 2, w // 2

    def kernel(*refs):
        # inputs: x, band_0..band_{L-1}, shift_0..shift_{L-1}
        x_ref = refs[0]
        w_refs = refs[1:1 + num_layers]
        s_refs = refs[1 + num_layers:1 + 2 * num_layers]
        o_ref = refs[1 + 2 * num_layers]
        scratch = refs[2 + 2 * num_layers:]
        pad_refs = scratch[:num_layers]          # zero-padded activations, (Dp,Hp,Wp*Cin)
        if pool:
            yw_ref = scratch[num_layers]         # last conv output, (d,h,w*cout)
            vw_ref = scratch[num_layers + 1]     # W-pooled,        (d,h,wo*cout)

        # Layer-0 input -> padded scratch (zero borders; interior fully overwritten).
        c0 = cins[0]
        p0 = pad_refs[0]
        p0[...] = jnp.zeros(p0.shape, p0.dtype)
        p0[pl.ds(1, d), pl.ds(1, h), pl.ds(c0, w * c0)] = x_ref[0]

        for l in range(num_layers):
            cin = cins[l]
            pad = pad_refs[l]

            # 3x3x3 conv as 9 band-Toeplitz matmuls; accumulator stays in registers.
            acc = jnp.zeros((dh, w * cout), jnp.float32)
            for kd in range(3):
                for kh in range(3):
                    t = kd * 3 + kh
                    slab = pad[pl.ds(kd, d), pl.ds(kh, h), :]      # (d, h, wp*cin)
                    slab = slab.reshape(dh, wp * cin)
                    acc = acc + jnp.dot(slab, w_refs[l][t],
                                        preferred_element_type=jnp.float32)

            # folded conv-bias + BN shift, then ReLU
            y = jnp.maximum(acc + s_refs[l][...], 0.0)             # (dh, w*cout)
            y = y.reshape(d, h, w * cout)

            if l + 1 < num_layers:
                nxt = pad_refs[l + 1]
                nxt[...] = jnp.zeros(nxt.shape, nxt.dtype)
                nxt[pl.ds(1, d), pl.ds(1, h), pl.ds(cout, w * cout)] = y
            elif pool:
                yw_ref[...] = y
            else:
                o_ref[...] = y.reshape(1, d, h, w * cout).astype(o_ref.dtype)

        if pool:
            # MaxPool3d(2,2) fully in-kernel.
            # W (fused into lanes): pairwise max of lane groups.
            for zo in range(wo):
                a = yw_ref[:, :, pl.ds((2 * zo) * cout, cout)]
                b = yw_ref[:, :, pl.ds((2 * zo + 1) * cout, cout)]
                vw_ref[:, :, pl.ds(zo * cout, cout)] = jnp.maximum(a, b)
            # H: strided sublane reads.
            vh = jnp.maximum(vw_ref[:, pl.ds(0, ho, stride=2), :],
                             vw_ref[:, pl.ds(1, ho, stride=2), :])   # (d, ho, wo*cout)
            # D: split the leading dim and take pairwise max.
            b2 = vh.reshape(do, 2, ho, wo * cout)
            pooled = jnp.maximum(b2[:, 0], b2[:, 1])                 # (do, ho, wo*cout)
            o_ref[...] = pooled.reshape(1, do, ho, wo * cout).astype(o_ref.dtype)

    return kernel


# ----------------------------------------------------------------------------
# Wrapper: fold BN/bias, build banded weights, build specs, call the fused kernel.
# ----------------------------------------------------------------------------
def conv_block_forward(x_ncdhw, layer_params, pool=True, dropout_block=0.1,
                       eps=1e-5):
    """ConvBlock.forward (eval mode).  x: (N, C, D, H, W); returns NCDHW."""
    n, cin0, d, h, w = x_ncdhw.shape
    cout = layer_params[0][0].shape[0]
    num_layers = len(layer_params)
    wp = w + 2
    if pool:
        assert d % 2 == 0 and h % 2 == 0 and w % 2 == 0, (d, h, w)

    # NCDHW -> NDHWC -> fuse (W, C) onto the last (lane) dim.
    x = jnp.transpose(x_ncdhw, (0, 2, 3, 4, 1)).reshape(n, d, h, w * cin0)

    # Fold conv bias + BN (eval) into banded per-(kd,kh) weights and a fused shift.
    #   band[kd*3+kh][wp_idx*cin + ci, z*cout + co] = W[co,ci,kd,kh,wp_idx-z]*scale[co]
    cins, bands, shifts = [], [], []
    for (wt, b, gamma, beta, mean, var) in layer_params:
        ci = wt.shape[1]
        cins.append(ci)
        s = gamma / jnp.sqrt(var + eps)
        t = beta - mean * s
        wf = jnp.transpose(wt, (2, 3, 4, 1, 0)) * s            # (3,3,3,ci,cout), BN-scaled
        band = jnp.zeros((3, 3, wp, ci, w, cout), jnp.float32)
        for z in range(w):
            for kw in range(3):
                band = band.at[:, :, z + kw, :, z, :].set(wf[:, :, kw, :, :])
        bands.append(band.reshape(9, wp * ci, w * cout).astype(jnp.float32))
        shifts.append(jnp.tile(b * s + t, w).reshape(1, w * cout).astype(jnp.float32))

    do, ho, wo = (d // 2, h // 2, w // 2) if pool else (d, h, w)

    kernel = _make_fused_kernel(num_layers, d, h, w, tuple(cins), cout, pool)

    in_specs = [pl.BlockSpec((1, d, h, w * cin0), lambda i: (i, 0, 0, 0))]
    for ci in cins:
        in_specs.append(pl.BlockSpec((9, wp * ci, w * cout), lambda i: (0, 0, 0)))
    for _ in cins:
        in_specs.append(pl.BlockSpec((1, w * cout), lambda i: (0, 0)))

    scratch_shapes = [pltpu.VMEM((d + 2, h + 2, wp * ci), jnp.float32)
                      for ci in cins]
    if pool:
        scratch_shapes.append(pltpu.VMEM((d, h, w * cout), jnp.float32))
        scratch_shapes.append(pltpu.VMEM((d, h, wo * cout), jnp.float32))

    flops = 2 * n * (d * h) * 9 * (w * cout) * sum(wp * ci for ci in cins)
    bytes_accessed = 4 * (x.size + sum(bd.size for bd in bands)
                          + sum(sh.size for sh in shifts)
                          + n * do * ho * wo * cout)

    out_f = pl.pallas_call(
        kernel,
        out_shape=jax.ShapeDtypeStruct((n, do, ho, wo * cout), x.dtype),
        grid_spec=pltpu.PrefetchScalarGridSpec(
            num_scalar_prefetch=0,
            grid=(n,),
            in_specs=in_specs,
            out_specs=pl.BlockSpec((1, do, ho, wo * cout),
                                   lambda i: (i, 0, 0, 0)),
            scratch_shapes=scratch_shapes),
        compiler_params=pltpu.CompilerParams(
            dimension_semantics=("parallel",),
            vmem_limit_bytes=32 * 1024 * 1024),
        cost_estimate=pl.CostEstimate(
            flops=flops, transcendentals=0, bytes_accessed=bytes_accessed),
    )(x, *bands, *shifts)

    # dropout_block > 0 adds nn.Dropout; identity in eval mode.
    del dropout_block
    out5d = out_f.reshape(n, do, ho, wo, cout)
    return jnp.transpose(out5d, (0, 4, 1, 2, 3))                 # NCDHW


# ----------------------------------------------------------------------------
# Pure-JAX reference (for correctness check)
# ----------------------------------------------------------------------------
def conv_block_reference(x_ncdhw, layer_params, pool=True, eps=1e-5):
    x = x_ncdhw
    for (w, b, gamma, beta, mean, var) in layer_params:
        x = lax.conv_general_dilated(
            x, w, window_strides=(1, 1, 1), padding="SAME",
            dimension_numbers=("NCDHW", "OIDHW", "NCDHW"))
        x = x + b[None, :, None, None, None]
        x = (x - mean[None, :, None, None, None]) / jnp.sqrt(
            var[None, :, None, None, None] + eps)
        x = x * gamma[None, :, None, None, None] + beta[None, :, None, None, None]
        x = jnp.maximum(x, 0.0)
    if pool:
        x = lax.reduce_window(x, -jnp.inf, lax.max,
                              (1, 1, 2, 2, 2), (1, 1, 2, 2, 2), "VALID")
    return x


# ----------------------------------------------------------------------------
# Main
# ----------------------------------------------------------------------------
if __name__ == "__main__":
    # ConvBlock(in_features=4, out_features=8, num=2, dropout_block=0.1, pool=True)
    in_features, out_features, num = 4, 8, 2
    N, D, H, W = 2, 8, 8, 8

    key = jax.random.PRNGKey(0)
    k_x, key = jax.random.split(key)
    x = jax.random.normal(k_x, (N, in_features, D, H, W), dtype=jnp.float32)

    layer_params = []
    cin = in_features
    for li in range(num):
        ks = jax.random.split(jax.random.fold_in(key, li), 6)
        w = 0.1 * jax.random.normal(ks[0], (out_features, cin, 3, 3, 3), jnp.float32)
        b = 0.1 * jax.random.normal(ks[1], (out_features,), jnp.float32)
        gamma = 1.0 + 0.1 * jax.random.normal(ks[2], (out_features,), jnp.float32)
        beta = 0.1 * jax.random.normal(ks[3], (out_features,), jnp.float32)
        mean = 0.1 * jax.random.normal(ks[4], (out_features,), jnp.float32)
        var = 1.0 + 0.1 * jax.random.uniform(ks[5], (out_features,), jnp.float32)
        layer_params.append((w, b, gamma, beta, mean, var))
        cin = out_features

    fwd = jax.jit(functools.partial(conv_block_forward, pool=True,
                                    dropout_block=0.1))
    out = jax.block_until_ready(fwd(x, layer_params))

    ref = conv_block_reference(x, layer_params, pool=True)
    assert out.shape == (N, out_features, D // 2, H // 2, W // 2), out.shape
    max_err = float(jnp.max(jnp.abs(out - ref)))
    assert jnp.allclose(out, ref, rtol=1e-4, atol=1e-4), max_err

    print("KERNEL_OK")
</pallas_src>

<mosaic_0001>
module attributes {stable_mosaic.version = 11 : i64} {
  func.func @kernel(%arg0: i32, %arg1: memref<1x8x8x32xf32, #tpu.memory_space<vmem>>, %arg2: memref<9x40x64xf32, #tpu.memory_space<vmem>>, %arg3: memref<9x80x64xf32, #tpu.memory_space<vmem>>, %arg4: memref<1x64xf32, #tpu.memory_space<vmem>>, %arg5: memref<1x64xf32, #tpu.memory_space<vmem>>, %arg6: memref<1x4x4x32xf32, #tpu.memory_space<vmem>>, %arg7: memref<10x10x40xf32, #tpu.memory_space<vmem>>, %arg8: memref<10x10x80xf32, #tpu.memory_space<vmem>>, %arg9: memref<8x8x64xf32, #tpu.memory_space<vmem>>, %arg10: memref<8x8x32xf32, #tpu.memory_space<vmem>>) attributes {dimension_semantics = [#tpu.dimension_semantics<parallel>], iteration_bounds = array<i64: 2>, scalar_prefetch = 0 : i64, scratch_operands = 4 : i64, tpu.core_type = #tpu.core_type<tc>, window_params = [{transform_indices = @transform_0, window_bounds = array<i64: 1, 8, 8, 32>}, {pipeline_mode = #tpu.pipeline_mode<synchronous>, transform_indices = @transform_1, window_bounds = array<i64: 9, 40, 64>}, {pipeline_mode = #tpu.pipeline_mode<synchronous>, transform_indices = @transform_2, window_bounds = array<i64: 9, 80, 64>}, {pipeline_mode = #tpu.pipeline_mode<synchronous>, transform_indices = @transform_3, window_bounds = array<i64: 1, 64>}, {pipeline_mode = #tpu.pipeline_mode<synchronous>, transform_indices = @transform_4, window_bounds = array<i64: 1, 64>}, {transform_indices = @transform_5, window_bounds = array<i64: 1, 4, 4, 32>}]} {
    %cst = arith.constant 0.000000e+00 : f32
    %0 = vector.broadcast %cst : f32 to vector<10x10x40xf32>
    %c0 = arith.constant 0 : index
    %c0_0 = arith.constant 0 : index
    %c0_1 = arith.constant 0 : index
    %1 = vector.load %arg7[%c0, %c0_0, %c0_1] : memref<10x10x40xf32, #tpu.memory_space<vmem>>, vector<10x10x40xf32>
    tpu.vector_store %arg7[%c0, %c0_0, %c0_1], %0 {strides = array<i32>} : memref<10x10x40xf32, #tpu.memory_space<vmem>>, vector<10x10x40xf32>,
    %c0_2 = arith.constant 0 : index
    %c0_3 = arith.constant 0 : index
    %c0_4 = arith.constant 0 : index
    %c0_5 = arith.constant 0 : index
    %2 = vector.load %arg1[%c0_2, %c0_3, %c0_4, %c0_5] : memref<1x8x8x32xf32, #tpu.memory_space<vmem>>, vector<1x8x8x32xf32>
    %3 = vector.shape_cast %2 : vector<1x8x8x32xf32> to vector<8x8x32xf32>
    %c1 = arith.constant 1 : index
    %c1_6 = arith.constant 1 : index
    %c4 = arith.constant 4 : index
    %4 = vector.load %arg7[%c1, %c1_6, %c4] : memref<10x10x40xf32, #tpu.memory_space<vmem>>, vector<8x8x32xf32>
    tpu.vector_store %arg7[%c1, %c1_6, %c4], %3 {strides = array<i32>} : memref<10x10x40xf32, #tpu.memory_space<vmem>>, vector<8x8x32xf32>,
    %cst_7 = arith.constant 0.000000e+00 : f32
    %5 = vector.broadcast %cst_7 : f32 to vector<64x64xf32>
    %c0_8 = arith.constant 0 : index
    %c0_9 = arith.constant 0 : index
    %c0_10 = arith.constant 0 : index
    %6 = vector.load %arg7[%c0_8, %c0_9, %c0_10] : memref<10x10x40xf32, #tpu.memory_space<vmem>>, vector<8x8x40xf32>
    %7 = vector.shape_cast %6 : vector<8x8x40xf32> to vector<64x40xf32>
    %c0_11 = arith.constant 0 : index
    %c0_12 = arith.constant 0 : index
    %c0_13 = arith.constant 0 : index
    %8 = vector.load %arg2[%c0_11, %c0_12, %c0_13] : memref<9x40x64xf32, #tpu.memory_space<vmem>>, vector<1x40x64xf32>
    %9 = vector.shape_cast %8 : vector<1x40x64xf32> to vector<40x64xf32>
    %cst_14 = arith.constant dense<0.000000e+00> : vector<64x64xf32>
    %10 = tpu.matmul %7, %9, %cst_14 {dimension_numbers = #tpu.dot_dimension_numbers<[1], [0], [0], [1], [0, 0, 1, 1], [], []>} : vector<64x40xf32>, vector<40x64xf32>, vector<64x64xf32> -> vector<64x64xf32>
    %11 = arith.addf %5, %10 : vector<64x64xf32>
    %c0_15 = arith.constant 0 : index
    %c1_16 = arith.constant 1 : index
    %c0_17 = arith.constant 0 : index
    %12 = vector.load %arg7[%c0_15, %c1_16, %c0_17] : memref<10x10x40xf32, #tpu.memory_space<vmem>>, vector<8x8x40xf32>
    %13 = vector.shape_cast %12 : vector<8x8x40xf32> to vector<64x40xf32>
    %c1_18 = arith.constant 1 : index
    %c0_19 = arith.constant 0 : index
    %c0_20 = arith.constant 0 : index
    %14 = vector.load %arg2[%c1_18, %c0_19, %c0_20] : memref<9x40x64xf32, #tpu.memory_space<vmem>>, vector<1x40x64xf32>
    %15 = vector.shape_cast %14 : vector<1x40x64xf32> to vector<40x64xf32>
    %cst_21 = arith.constant dense<0.000000e+00> : vector<64x64xf32>
    %16 = tpu.matmul %13, %15, %cst_21 {dimension_numbers = #tpu.dot_dimension_numbers<[1], [0], [0], [1], [0, 0, 1, 1], [], []>} : vector<64x40xf32>, vector<40x64xf32>, vector<64x64xf32> -> vector<64x64xf32>
    %17 = arith.addf %11, %16 : vector<64x64xf32>
    %c0_22 = arith.constant 0 : index
    %c2 = arith.constant 2 : index
    %c0_23 = arith.constant 0 : index
    %18 = vector.load %arg7[%c0_22, %c2, %c0_23] : memref<10x10x40xf32, #tpu.memory_space<vmem>>, vector<8x8x40xf32>
    %19 = vector.shape_cast %18 : vector<8x8x40xf32> to vector<64x40xf32>
    %c2_24 = arith.constant 2 : index
    %c0_25 = arith.constant 0 : index
    %c0_26 = arith.constant 0 : index
    %20 = vector.load %arg2[%c2_24, %c0_25, %c0_26] : memref<9x40x64xf32, #tpu.memory_space<vmem>>, vector<1x40x64xf32>
    %21 = vector.shape_cast %20 : vector<1x40x64xf32> to vector<40x64xf32>
    %cst_27 = arith.constant dense<0.000000e+00> : vector<64x64xf32>
    %22 = tpu.matmul %19, %21, %cst_27 {dimension_numbers = #tpu.dot_dimension_numbers<[1], [0], [0], [1], [0, 0, 1, 1], [], []>} : vector<64x40xf32>, vector<40x64xf32>, vector<64x64xf32> -> vector<64x64xf32>
    %23 = arith.addf %17, %22 : vector<64x64xf32>
    %c1_28 = arith.constant 1 : index
    %c0_29 = arith.constant 0 : index
    %c0_30 = arith.constant 0 : index
    %24 = vector.load %arg7[%c1_28, %c0_29, %c0_30] : memref<10x10x40xf32, #tpu.memory_space<vmem>>, vector<8x8x40xf32>
    %25 = vector.shape_cast %24 : vector<8x8x40xf32> to vector<64x40xf32>
    %c3 = arith.constant 3 : index
    %c0_31 = arith.constant 0 : index
    %c0_32 = arith.constant 0 : index
    %26 = vector.load %arg2[%c3, %c0_31, %c0_32] : memref<9x40x64xf32, #tpu.memory_space<vmem>>, vector<1x40x64xf32>
    %27 = vector.shape_cast %26 : vector<1x40x64xf32> to vector<40x64xf32>
    %cst_33 = arith.constant dense<0.000000e+00> : vector<64x64xf32>
    %28 = tpu.matmul %25, %27, %cst_33 {dimension_numbers = #tpu.dot_dimension_numbers<[1], [0], [0], [1], [0, 0, 1, 1], [], []>} : vector<64x40xf32>, vector<40x64xf32>, vector<64x64xf32> -> vector<64x64xf32>
    %29 = arith.addf %23, %28 : vector<64x64xf32>
    %c1_34 = arith.constant 1 : index
    %c1_35 = arith.constant 1 : index
    %c0_36 = arith.constant 0 : index
    %30 = vector.load %arg7[%c1_34, %c1_35, %c0_36] : memref<10x10x40xf32, #tpu.memory_space<vmem>>, vector<8x8x40xf32>
    %31 = vector.shape_cast %30 : vector<8x8x40xf32> to vector<64x40xf32>
    %c4_37 = arith.constant 4 : index
    %c0_38 = arith.constant 0 : index
    %c0_39 = arith.constant 0 : index
    %32 = vector.load %arg2[%c4_37, %c0_38, %c0_39] : memref<9x40x64xf32, #tpu.memory_space<vmem>>, vector<1x40x64xf32>
    %33 = vector.shape_cast %32 : vector<1x40x64xf32> to vector<40x64xf32>
    %cst_40 = arith.constant dense<0.000000e+00> : vector<64x64xf32>
    %34 = tpu.matmul %31, %33, %cst_40 {dimension_numbers = #tpu.dot_dimension_numbers<[1], [0], [0], [1], [0, 0, 1, 1], [], []>} : vector<64x40xf32>, vector<40x64xf32>, vector<64x64xf32> -> vector<64x64xf32>
    %35 = arith.addf %29, %34 : vector<64x64xf32>
    %c1_41 = arith.constant 1 : index
    %c2_42 = arith.constant 2 : index
    %c0_43 = arith.constant 0 : index
    %36 = vector.load %arg7[%c1_41, %c2_42, %c0_43] : memref<10x10x40xf32, #tpu.memory_space<vmem>>, vector<8x8x40xf32>
    %37 = vector.shape_cast %36 : vector<8x8x40xf32> to vector<64x40xf32>
    %c5 = arith.constant 5 : index
    %c0_44 = arith.constant 0 : index
    %c0_45 = arith.constant 0 : index
    %38 = vector.load %arg2[%c5, %c0_44, %c0_45] : memref<9x40x64xf32, #tpu.memory_space<vmem>>, vector<1x40x64xf32>
    %39 = vector.shape_cast %38 : vector<1x40x64xf32> to vector<40x64xf32>
    %cst_46 = arith.constant dense<0.000000e+00> : vector<64x64xf32>
    %40 = tpu.matmul %37, %39, %cst_46 {dimension_numbers = #tpu.dot_dimension_numbers<[1], [0], [0], [1], [0, 0, 1, 1], [], []>} : vector<64x40xf32>, vector<40x64xf32>, vector<64x64xf32> -> vector<64x64xf32>
    %41 = arith.addf %35, %40 : vector<64x64xf32>
    %c2_47 = arith.constant 2 : index
    %c0_48 = arith.constant 0 : index
    %c0_49 = arith.constant 0 : index
    %42 = vector.load %arg7[%c2_47, %c0_48, %c0_49] : memref<10x10x40xf32, #tpu.memory_space<vmem>>, vector<8x8x40xf32>
    %43 = vector.shape_cast %42 : vector<8x8x40xf32> to vector<64x40xf32>
    %c6 = arith.constant 6 : index
    %c0_50 = arith.constant 0 : index
    %c0_51 = arith.constant 0 : index
    %44 = vector.load %arg2[%c6, %c0_50, %c0_51] : memref<9x40x64xf32, #tpu.memory_space<vmem>>, vector<1x40x64xf32>
    %45 = vector.shape_cast %44 : vector<1x40x64xf32> to vector<40x64xf32>
    %cst_52 = arith.constant dense<0.000000e+00> : vector<64x64xf32>
    %46 = tpu.matmul %43, %45, %cst_52 {dimension_numbers = #tpu.dot_dimension_numbers<[1], [0], [0], [1], [0, 0, 1, 1], [], []>} : vector<64x40xf32>, vector<40x64xf32>, vector<64x64xf32> -> vector<64x64xf32>
    %47 = arith.addf %41, %46 : vector<64x64xf32>
    %c2_53 = arith.constant 2 : index
    %c1_54 = arith.constant 1 : index
    %c0_55 = arith.constant 0 : index
    %48 = vector.load %arg7[%c2_53, %c1_54, %c0_55] : memref<10x10x40xf32, #tpu.memory_space<vmem>>, vector<8x8x40xf32>
    %49 = vector.shape_cast %48 : vector<8x8x40xf32> to vector<64x40xf32>
    %c7 = arith.constant 7 : index
    %c0_56 = arith.constant 0 : index
    %c0_57 = arith.constant 0 : index
    %50 = vector.load %arg2[%c7, %c0_56, %c0_57] : memref<9x40x64xf32, #tpu.memory_space<vmem>>, vector<1x40x64xf32>
    %51 = vector.shape_cast %50 : vector<1x40x64xf32> to vector<40x64xf32>
    %cst_58 = arith.constant dense<0.000000e+00> : vector<64x64xf32>
    %52 = tpu.matmul %49, %51, %cst_58 {dimension_numbers = #tpu.dot_dimension_numbers<[1], [0], [0], [1], [0, 0, 1, 1], [], []>} : vector<64x40xf32>, vector<40x64xf32>, vector<64x64xf32> -> vector<64x64xf32>
    %53 = arith.addf %47, %52 : vector<64x64xf32>
    %c2_59 = arith.constant 2 : index
    %c2_60 = arith.constant 2 : index
    %c0_61 = arith.constant 0 : index
    %54 = vector.load %arg7[%c2_59, %c2_60, %c0_61] : memref<10x10x40xf32, #tpu.memory_space<vmem>>, vector<8x8x40xf32>
    %55 = vector.shape_cast %54 : vector<8x8x40xf32> to vector<64x40xf32>
    %c8 = arith.constant 8 : index
    %c0_62 = arith.constant 0 : index
    %c0_63 = arith.constant 0 : index
    %56 = vector.load %arg2[%c8, %c0_62, %c0_63] : memref<9x40x64xf32, #tpu.memory_space<vmem>>, vector<1x40x64xf32>
    %57 = vector.shape_cast %56 : vector<1x40x64xf32> to vector<40x64xf32>
    %cst_64 = arith.constant dense<0.000000e+00> : vector<64x64xf32>
    %58 = tpu.matmul %55, %57, %cst_64 {dimension_numbers = #tpu.dot_dimension_numbers<[1], [0], [0], [1], [0, 0, 1, 1], [], []>} : vector<64x40xf32>, vector<40x64xf32>, vector<64x64xf32> -> vector<64x64xf32>
    %59 = arith.addf %53, %58 : vector<64x64xf32>
    %c0_65 = arith.constant 0 : index
    %c0_66 = arith.constant 0 : index
    %60 = vector.load %arg4[%c0_65, %c0_66] : memref<1x64xf32, #tpu.memory_space<vmem>>, vector<1x64xf32>
    %61 = vector.broadcast %60 : vector<1x64xf32> to vector<64x64xf32>
    %62 = arith.addf %59, %61 : vector<64x64xf32>
    %cst_67 = arith.constant 0.000000e+00 : f32
    %63 = vector.broadcast %cst_67 : f32 to vector<64x64xf32>
    %64 = arith.maximumf %62, %63 : vector<64x64xf32>
    %65 = vector.shape_cast %64 : vector<64x64xf32> to vector<8x8x64xf32>
    %cst_68 = arith.constant 0.000000e+00 : f32
    %66 = vector.broadcast %cst_68 : f32 to vector<10x10x80xf32>
    %c0_69 = arith.constant 0 : index
    %c0_70 = arith.constant 0 : index
    %c0_71 = arith.constant 0 : index
    %67 = vector.load %arg8[%c0_69, %c0_70, %c0_71] : memref<10x10x80xf32, #tpu.memory_space<vmem>>, vector<10x10x80xf32>
    tpu.vector_store %arg8[%c0_69, %c0_70, %c0_71], %66 {strides = array<i32>} : memref<10x10x80xf32, #tpu.memory_space<vmem>>, vector<10x10x80xf32>,
    %c1_72 = arith.constant 1 : index
    %c1_73 = arith.constant 1 : index
    %c8_74 = arith.constant 8 : index
    %68 = vector.load %arg8[%c1_72, %c1_73, %c8_74] : memref<10x10x80xf32, #tpu.memory_space<vmem>>, vector<8x8x64xf32>
    tpu.vector_store %arg8[%c1_72, %c1_73, %c8_74], %65 {strides = array<i32>} : memref<10x10x80xf32, #tpu.memory_space<vmem>>, vector<8x8x64xf32>,
    %cst_75 = arith.constant 0.000000e+00 : f32
    %69 = vector.broadcast %cst_75 : f32 to vector<64x64xf32>
    %c0_76 = arith.constant 0 : index
    %c0_77 = arith.constant 0 : index
    %c0_78 = arith.constant 0 : index
    %70 = vector.load %arg8[%c0_76, %c0_77, %c0_78] : memref<10x10x80xf32, #tpu.memory_space<vmem>>, vector<8x8x80xf32>
    %71 = vector.shape_cast %70 : vector<8x8x80xf32> to vector<64x80xf32>
    %c0_79 = arith.constant 0 : index
    %c0_80 = arith.constant 0 : index
    %c0_81 = arith.constant 0 : index
    %72 = vector.load %arg3[%c0_79, %c0_80, %c0_81] : memref<9x80x64xf32, #tpu.memory_space<vmem>>, vector<1x80x64xf32>
    %73 = vector.shape_cast %72 : vector<1x80x64xf32> to vector<80x64xf32>
    %cst_82 = arith.constant dense<0.000000e+00> : vector<64x64xf32>
    %74 = tpu.matmul %71, %73, %cst_82 {dimension_numbers = #tpu.dot_dimension_numbers<[1], [0], [0], [1], [0, 0, 1, 1], [], []>} : vector<64x80xf32>, vector<80x64xf32>, vector<64x64xf32> -> vector<64x64xf32>
    %75 = arith.addf %69, %74 : vector<64x64xf32>
    %c0_83 = arith.constant 0 : index
    %c1_84 = arith.constant 1 : index
    %c0_85 = arith.constant 0 : index
    %76 = vector.load %arg8[%c0_83, %c1_84, %c0_85] : memref<10x10x80xf32, #tpu.memory_space<vmem>>, vector<8x8x80xf32>
    %77 = vector.shape_cast %76 : vector<8x8x80xf32> to vector<64x80xf32>
    %c1_86 = arith.constant 1 : index
    %c0_87 = arith.constant 0 : index
    %c0_88 = arith.constant 0 : index
    %78 = vector.load %arg3[%c1_86, %c0_87, %c0_88] : memref<9x80x64xf32, #tpu.memory_space<vmem>>, vector<1x80x64xf32>
    %79 = vector.shape_cast %78 : vector<1x80x64xf32> to vector<80x64xf32>
    %cst_89 = arith.constant dense<0.000000e+00> : vector<64x64xf32>
    %80 = tpu.matmul %77, %79, %cst_89 {dimension_numbers = #tpu.dot_dimension_numbers<[1], [0], [0], [1], [0, 0, 1, 1], [], []>} : vector<64x80xf32>, vector<80x64xf32>, vector<64x64xf32> -> vector<64x64xf32>
    %81 = arith.addf %75, %80 : vector<64x64xf32>
    %c0_90 = arith.constant 0 : index
    %c2_91 = arith.constant 2 : index
    %c0_92 = arith.constant 0 : index
    %82 = vector.load %arg8[%c0_90, %c2_91, %c0_92] : memref<10x10x80xf32, #tpu.memory_space<vmem>>, vector<8x8x80xf32>
    %83 = vector.shape_cast %82 : vector<8x8x80xf32> to vector<64x80xf32>
    %c2_93 = arith.constant 2 : index
    %c0_94 = arith.constant 0 : index
    %c0_95 = arith.constant 0 : index
    %84 = vector.load %arg3[%c2_93, %c0_94, %c0_95] : memref<9x80x64xf32, #tpu.memory_space<vmem>>, vector<1x80x64xf32>
    %85 = vector.shape_cast %84 : vector<1x80x64xf32> to vector<80x64xf32>
    %cst_96 = arith.constant dense<0.000000e+00> : vector<64x64xf32>
    %86 = tpu.matmul %83, %85, %cst_96 {dimension_numbers = #tpu.dot_dimension_numbers<[1], [0], [0], [1], [0, 0, 1, 1], [], []>} : vector<64x80xf32>, vector<80x64xf32>, vector<64x64xf32> -> vector<64x64xf32>
    %87 = arith.addf %81, %86 : vector<64x64xf32>
    %c1_97 = arith.constant 1 : index
    %c0_98 = arith.constant 0 : index
    %c0_99 = arith.constant 0 : index
    %88 = vector.load %arg8[%c1_97, %c0_98, %c0_99] : memref<10x10x80xf32, #tpu.memory_space<vmem>>, vector<8x8x80xf32>
    %89 = vector.shape_cast %88 : vector<8x8x80xf32> to vector<64x80xf32>
    %c3_100 = arith.constant 3 : index
    %c0_101 = arith.constant 0 : index
    %c0_102 = arith.constant 0 : index
    %90 = vector.load %arg3[%c3_100, %c0_101, %c0_102] : memref<9x80x64xf32, #tpu.memory_space<vmem>>, vector<1x80x64xf32>
    %91 = vector.shape_cast %90 : vector<1x80x64xf32> to vector<80x64xf32>
    %cst_103 = arith.constant dense<0.000000e+00> : vector<64x64xf32>
    %92 = tpu.matmul %89, %91, %cst_103 {dimension_numbers = #tpu.dot_dimension_numbers<[1], [0], [0], [1], [0, 0, 1, 1], [], []>} : vector<64x80xf32>, vector<80x64xf32>, vector<64x64xf32> -> vector<64x64xf32>
    %93 = arith.addf %87, %92 : vector<64x64xf32>
    %c1_104 = arith.constant 1 : index
    %c1_105 = arith.constant 1 : index
    %c0_106 = arith.constant 0 : index
    %94 = vector.load %arg8[%c1_104, %c1_105, %c0_106] : memref<10x10x80xf32, #tpu.memory_space<vmem>>, vector<8x8x80xf32>
    %95 = vector.shape_cast %94 : vector<8x8x80xf32> to vector<64x80xf32>
    %c4_107 = arith.constant 4 : index
    %c0_108 = arith.constant 0 : index
    %c0_109 = arith.constant 0 : index
    %96 = vector.load %arg3[%c4_107, %c0_108, %c0_109] : memref<9x80x64xf32, #tpu.memory_space<vmem>>, vector<1x80x64xf32>
    %97 = vector.shape_cast %96 : vector<1x80x64xf32> to vector<80x64xf32>
    %cst_110 = arith.constant dense<0.000000e+00> : vector<64x64xf32>
    %98 = tpu.matmul %95, %97, %cst_110 {dimension_numbers = #tpu.dot_dimension_numbers<[1], [0], [0], [1], [0, 0, 1, 1], [], []>} : vector<64x80xf32>, vector<80x64xf32>, vector<64x64xf32> -> vector<64x64xf32>
    %99 = arith.addf %93, %98 : vector<64x64xf32>
    %c1_111 = arith.constant 1 : index
    %c2_112 = arith.constant 2 : index
    %c0_113 = arith.constant 0 : index
    %100 = vector.load %arg8[%c1_111, %c2_112, %c0_113] : memref<10x10x80xf32, #tpu.memory_space<vmem>>, vector<8x8x80xf32>
    %101 = vector.shape_cast %100 : vector<8x8x80xf32> to vector<64x80xf32>
    %c5_114 = arith.constant 5 : index
    %c0_115 = arith.constant 0 : index
    %c0_116 = arith.constant 0 : index
    %102 = vector.load %arg3[%c5_114, %c0_115, %c0_116] : memref<9x80x64xf32, #tpu.memory_space<vmem>>, vector<1x80x64xf32>
    %103 = vector.shape_cast %102 : vector<1x80x64xf32> to vector<80x64xf32>
    %cst_117 = arith.constant dense<0.000000e+00> : vector<64x64xf32>
    %104 = tpu.matmul %101, %103, %cst_117 {dimension_numbers = #tpu.dot_dimension_numbers<[1], [0], [0], [1], [0, 0, 1, 1], [], []>} : vector<64x80xf32>, vector<80x64xf32>, vector<64x64xf32> -> vector<64x64xf32>
    %105 = arith.addf %99, %104 : vector<64x64xf32>
    %c2_118 = arith.constant 2 : index
    %c0_119 = arith.constant 0 : index
    %c0_120 = arith.constant 0 : index
    %106 = vector.load %arg8[%c2_118, %c0_119, %c0_120] : memref<10x10x80xf32, #tpu.memory_space<vmem>>, vector<8x8x80xf32>
    %107 = vector.shape_cast %106 : vector<8x8x80xf32> to vector<64x80xf32>
    %c6_121 = arith.constant 6 : index
    %c0_122 = arith.constant 0 : index
    %c0_123 = arith.constant 0 : index
    %108 = vector.load %arg3[%c6_121, %c0_122, %c0_123] : memref<9x80x64xf32, #tpu.memory_space<vmem>>, vector<1x80x64xf32>
    %109 = vector.shape_cast %108 : vector<1x80x64xf32> to vector<80x64xf32>
    %cst_124 = arith.constant dense<0.000000e+00> : vector<64x64xf32>
    %110 = tpu.matmul %107, %109, %cst_124 {dimension_numbers = #tpu.dot_dimension_numbers<[1], [0], [0], [1], [0, 0, 1, 1], [], []>} : vector<64x80xf32>, vector<80x64xf32>, vector<64x64xf32> -> vector<64x64xf32>
    %111 = arith.addf %105, %110 : vector<64x64xf32>
    %c2_125 = arith.constant 2 : index
    %c1_126 = arith.constant 1 : index
    %c0_127 = arith.constant 0 : index
    %112 = vector.load %arg8[%c2_125, %c1_126, %c0_127] : memref<10x10x80xf32, #tpu.memory_space<vmem>>, vector<8x8x80xf32>
    %113 = vector.shape_cast %112 : vector<8x8x80xf32> to vector<64x80xf32>
    %c7_128 = arith.constant 7 : index
    %c0_129 = arith.constant 0 : index
    %c0_130 = arith.constant 0 : index
    %114 = vector.load %arg3[%c7_128, %c0_129, %c0_130] : memref<9x80x64xf32, #tpu.memory_space<vmem>>, vector<1x80x64xf32>
    %115 = vector.shape_cast %114 : vector<1x80x64xf32> to vector<80x64xf32>
    %cst_131 = arith.constant dense<0.000000e+00> : vector<64x64xf32>
    %116 = tpu.matmul %113, %115, %cst_131 {dimension_numbers = #tpu.dot_dimension_numbers<[1], [0], [0], [1], [0, 0, 1, 1], [], []>} : vector<64x80xf32>, vector<80x64xf32>, vector<64x64xf32> -> vector<64x64xf32>
    %117 = arith.addf %111, %116 : vector<64x64xf32>
    %c2_132 = arith.constant 2 : index
    %c2_133 = arith.constant 2 : index
    %c0_134 = arith.constant 0 : index
    %118 = vector.load %arg8[%c2_132, %c2_133, %c0_134] : memref<10x10x80xf32, #tpu.memory_space<vmem>>, vector<8x8x80xf32>
    %119 = vector.shape_cast %118 : vector<8x8x80xf32> to vector<64x80xf32>
    %c8_135 = arith.constant 8 : index
    %c0_136 = arith.constant 0 : index
    %c0_137 = arith.constant 0 : index
    %120 = vector.load %arg3[%c8_135, %c0_136, %c0_137] : memref<9x80x64xf32, #tpu.memory_space<vmem>>, vector<1x80x64xf32>
    %121 = vector.shape_cast %120 : vector<1x80x64xf32> to vector<80x64xf32>
    %cst_138 = arith.constant dense<0.000000e+00> : vector<64x64xf32>
    %122 = tpu.matmul %119, %121, %cst_138 {dimension_numbers = #tpu.dot_dimension_numbers<[1], [0], [0], [1], [0, 0, 1, 1], [], []>} : vector<64x80xf32>, vector<80x64xf32>, vector<64x64xf32> -> vector<64x64xf32>
    %123 = arith.addf %117, %122 : vector<64x64xf32>
    %c0_139 = arith.constant 0 : index
    %c0_140 = arith.constant 0 : index
    %124 = vector.load %arg5[%c0_139, %c0_140] : memref<1x64xf32, #tpu.memory_space<vmem>>, vector<1x64xf32>
    %125 = vector.broadcast %124 : vector<1x64xf32> to vector<64x64xf32>
    %126 = arith.addf %123, %125 : vector<64x64xf32>
    %cst_141 = arith.constant 0.000000e+00 : f32
    %127 = vector.broadcast %cst_141 : f32 to vector<64x64xf32>
    %128 = arith.maximumf %126, %127 : vector<64x64xf32>
    %129 = vector.shape_cast %128 : vector<64x64xf32> to vector<8x8x64xf32>
    %c0_142 = arith.constant 0 : index
    %c0_143 = arith.constant 0 : index
    %c0_144 = arith.constant 0 : index
    %130 = vector.load %arg9[%c0_142, %c0_143, %c0_144] : memref<8x8x64xf32, #tpu.memory_space<vmem>>, vector<8x8x64xf32>
    tpu.vector_store %arg9[%c0_142, %c0_143, %c0_144], %129 {strides = array<i32>} : memref<8x8x64xf32, #tpu.memory_space<vmem>>, vector<8x8x64xf32>,
    %c0_145 = arith.constant 0 : index
    %c0_146 = arith.constant 0 : index
    %c0_147 = arith.constant 0 : index
    %131 = vector.load %arg9[%c0_145, %c0_146, %c0_147] : memref<8x8x64xf32, #tpu.memory_space<vmem>>, vector<8x8x8xf32>
    %c0_148 = arith.constant 0 : index
    %c0_149 = arith.constant 0 : index
    %c8_150 = arith.constant 8 : index
    %132 = vector.load %arg9[%c0_148, %c0_149, %c8_150] : memref<8x8x64xf32, #tpu.memory_space<vmem>>, vector<8x8x8xf32>
    %133 = arith.maximumf %131, %132 : vector<8x8x8xf32>
    %c0_151 = arith.constant 0 : index
    %c0_152 = arith.constant 0 : index
    %c0_153 = arith.constant 0 : index
    %134 = vector.load %arg10[%c0_151, %c0_152, %c0_153] : memref<8x8x32xf32, #tpu.memory_space<vmem>>, vector<8x8x8xf32>
    tpu.vector_store %arg10[%c0_151, %c0_152, %c0_153], %133 {strides = array<i32>} : memref<8x8x32xf32, #tpu.memory_space<vmem>>, vector<8x8x8xf32>,
    %c0_154 = arith.constant 0 : index
    %c0_155 = arith.constant 0 : index
    %c16 = arith.constant 16 : index
    %135 = vector.load %arg9[%c0_154, %c0_155, %c16] : memref<8x8x64xf32, #tpu.memory_space<vmem>>, vector<8x8x8xf32>
    %c0_156 = arith.constant 0 : index
    %c0_157 = arith.constant 0 : index
    %c24 = arith.constant 24 : index
    %136 = vector.load %arg9[%c0_156, %c0_157, %c24] : memref<8x8x64xf32, #tpu.memory_space<vmem>>, vector<8x8x8xf32>
    %137 = arith.maximumf %135, %136 : vector<8x8x8xf32>
    %c0_158 = arith.constant 0 : index
    %c0_159 = arith.constant 0 : index
    %c8_160 = arith.constant 8 : index
    %138 = vector.load %arg10[%c0_158, %c0_159, %c8_160] : memref<8x8x32xf32, #tpu.memory_space<vmem>>, vector<8x8x8xf32>
    tpu.vector_store %arg10[%c0_158, %c0_159, %c8_160], %137 {strides = array<i32>} : memref<8x8x32xf32, #tpu.memory_space<vmem>>, vector<8x8x8xf32>,
    %c0_161 = arith.constant 0 : index
    %c0_162 = arith.constant 0 : index
    %c32 = arith.constant 32 : index
    %139 = vector.load %arg9[%c0_161, %c0_162, %c32] : memref<8x8x64xf32, #tpu.memory_space<vmem>>, vector<8x8x8xf32>
    %c0_163 = arith.constant 0 : index
    %c0_164 = arith.constant 0 : index
    %c40 = arith.constant 40 : index
    %140 = vector.load %arg9[%c0_163, %c0_164, %c40] : memref<8x8x64xf32, #tpu.memory_space<vmem>>, vector<8x8x8xf32>
    %141 = arith.maximumf %139, %140 : vector<8x8x8xf32>
    %c0_165 = arith.constant 0 : index
    %c0_166 = arith.constant 0 : index
    %c16_167 = arith.constant 16 : index
    %142 = vector.load %arg10[%c0_165, %c0_166, %c16_167] : memref<8x8x32xf32, #tpu.memory_space<vmem>>, vector<8x8x8xf32>
    tpu.vector_store %arg10[%c0_165, %c0_166, %c16_167], %141 {strides = array<i32>} : memref<8x8x32xf32, #tpu.memory_space<vmem>>, vector<8x8x8xf32>,
    %c0_168 = arith.constant 0 : index
    %c0_169 = arith.constant 0 : index
    %c48 = arith.constant 48 : index
    %143 = vector.load %arg9[%c0_168, %c0_169, %c48] : memref<8x8x64xf32, #tpu.memory_space<vmem>>, vector<8x8x8xf32>
    %c0_170 = arith.constant 0 : index
    %c0_171 = arith.constant 0 : index
    %c56 = arith.constant 56 : index
    %144 = vector.load %arg9[%c0_170, %c0_171, %c56] : memref<8x8x64xf32, #tpu.memory_space<vmem>>, vector<8x8x8xf32>
    %145 = arith.maximumf %143, %144 : vector<8x8x8xf32>
    %c0_172 = arith.constant 0 : index
    %c0_173 = arith.constant 0 : index
    %c24_174 = arith.constant 24 : index
    %146 = vector.load %arg10[%c0_172, %c0_173, %c24_174] : memref<8x8x32xf32, #tpu.memory_space<vmem>>, vector<8x8x8xf32>
    tpu.vector_store %arg10[%c0_172, %c0_173, %c24_174], %145 {strides = array<i32>} : memref<8x8x32xf32, #tpu.memory_space<vmem>>, vector<8x8x8xf32>,
    %c0_175 = arith.constant 0 : index
    %c0_176 = arith.constant 0 : index
    %c0_177 = arith.constant 0 : index
    %147 = tpu.strided_load %arg10[%c0_175, %c0_176, %c0_177] {strides = array<i32: 1, 2, 1>} : memref<8x8x32xf32, #tpu.memory_space<vmem>>, vector<8x4x32xf32>
    %c0_178 = arith.constant 0 : index
    %c1_179 = arith.constant 1 : index
    %c0_180 = arith.constant 0 : index
    %148 = tpu.strided_load %arg10[%c0_178, %c1_179, %c0_180] {strides = array<i32: 1, 2, 1>} : memref<8x8x32xf32, #tpu.memory_space<vmem>>, vector<8x4x32xf32>
    %149 = arith.maximumf %147, %148 : vector<8x4x32xf32>
    %150 = vector.shape_cast %149 : vector<8x4x32xf32> to vector<4x2x4x32xf32>
    %151 = vector.extract_strided_slice %150 {offsets = [0, 0, 0, 0], sizes = [4, 1, 4, 32], strides = [1, 1, 1, 1]} : vector<4x2x4x32xf32> to vector<4x1x4x32xf32>
    %152 = vector.shape_cast %151 : vector<4x1x4x32xf32> to vector<4x4x32xf32>
    %153 = vector.extract_strided_slice %150 {offsets = [0, 1, 0, 0], sizes = [4, 1, 4, 32], strides = [1, 1, 1, 1]} : vector<4x2x4x32xf32> to vector<4x1x4x32xf32>
    %154 = vector.shape_cast %153 : vector<4x1x4x32xf32> to vector<4x4x32xf32>
    %155 = arith.maximumf %152, %154 : vector<4x4x32xf32>
    %156 = vector.shape_cast %155 : vector<4x4x32xf32> to vector<1x4x4x32xf32>
    %c0_181 = arith.constant 0 : index
    %c0_182 = arith.constant 0 : index
    %c0_183 = arith.constant 0 : index
    %c0_184 = arith.constant 0 : index
    %157 = vector.load %arg6[%c0_181, %c0_182, %c0_183, %c0_184] : memref<1x4x4x32xf32, #tpu.memory_space<vmem>>, vector<1x4x4x32xf32>
    tpu.vector_store %arg6[%c0_181, %c0_182, %c0_183, %c0_184], %156 {strides = array<i32>} : memref<1x4x4x32xf32, #tpu.memory_space<vmem>>, vector<1x4x4x32xf32>,
    return
  }
  func.func @transform_0(%arg0: i32) -> (i32, i32, i32, i32) {
    %c0_i32 = arith.constant 0 : i32
    %c0_i32_0 = arith.constant 0 : i32
    %c0_i32_1 = arith.constant 0 : i32
    %c0_i32_2 = arith.constant 0 : i32
    return %arg0, %c0_i32, %c0_i32_0, %c0_i32_1 : i32, i32, i32, i32
  }
  func.func @transform_1(%arg0: i32) -> (i32, i32, i32) {
    %c0_i32 = arith.constant 0 : i32
    %c0_i32_0 = arith.constant 0 : i32
    %c0_i32_1 = arith.constant 0 : i32
    %c0_i32_2 = arith.constant 0 : i32
    return %c0_i32, %c0_i32_0, %c0_i32_1 : i32, i32, i32
  }
  func.func @transform_2(%arg0: i32) -> (i32, i32, i32) {
    %c0_i32 = arith.constant 0 : i32
    %c0_i32_0 = arith.constant 0 : i32
    %c0_i32_1 = arith.constant 0 : i32
    %c0_i32_2 = arith.constant 0 : i32
    return %c0_i32, %c0_i32_0, %c0_i32_1 : i32, i32, i32
  }
  func.func @transform_3(%arg0: i32) -> (i32, i32) {
    %c0_i32 = arith.constant 0 : i32
    %c0_i32_0 = arith.constant 0 : i32
    %c0_i32_1 = arith.constant 0 : i32
    return %c0_i32, %c0_i32_0 : i32, i32
  }
  func.func @transform_4(%arg0: i32) -> (i32, i32) {
    %c0_i32 = arith.constant 0 : i32
    %c0_i32_0 = arith.constant 0 : i32
    %c0_i32_1 = arith.constant 0 : i32
    return %c0_i32, %c0_i32_0 : i32, i32
  }
  func.func @transform_5(%arg0: i32) -> (i32, i32, i32, i32) {
    %c0_i32 = arith.constant 0 : i32
    %c0_i32_0 = arith.constant 0 : i32
    %c0_i32_1 = arith.constant 0 : i32
    %c0_i32_2 = arith.constant 0 : i32
    return %arg0, %c0_i32, %c0_i32_0, %c0_i32_1 : i32, i32, i32, i32
  }
}

</mosaic_0001>

<bundles_post_ra>
// kernel: tile.13
= control target key start
LH: loop header
LB: loop body
LE: loop exit
PB: predicated region body
PF: predicated region fallthrough
CT: control target
= control target key end

     0   :  { %s22_s0 = inlined_call_operand.vmem [shape: f32[8], index: 0, kind: input, shape index: {}]   ;;  %s23_s1 = inlined_call_operand.vmem [shape: f32[8,8], index: 1, kind: output, shape index: {}]  }
   0x1   :  { %v4_v0 = vld [vmem:[%s22_s0] ss:$0 sm:$0xff] }
   0x2   :  { %5 = vst [vmem:[%s23_s1] sm:$0xff] %v4_v0 }

// kernel: tile.14
= control target key start
LH: loop header
LB: loop body
LE: loop exit
PB: predicated region body
PF: predicated region fallthrough
CT: control target
= control target key end

     0   :  { %s69_s10 = smov 56   ;;  %s70_s11 = smov 40   ;;  %vm3_vm0 = vcmask 64512   ;;  %vm9_vm1 = vcmask 523712   ;;  %vm15_vm2 = vcmask 458112   ;;  %vm21_vm3 = vcmask 392512   ;;  %s113_s0 = inlined_call_operand.vmem [shape: f32[8,8], index: 0, kind: input, shape index: {}]   ;;  %s114_s1 = inlined_call_operand.vmem [shape: f32[1,64], index: 1, kind: output, shape index: {}]  }
   0x1   :  { %v55_v0 = vld [vmem:[%s113_s0 + $0x7] sm:$0x1]   ;;  %v57_v1 = vld [vmem:[%s113_s0 + $0x5] sm:$0x1]   ;;  %v56_v2 = vld [vmem:[%s113_s0 + $0x6] sm:$0x1]  }
   0x2   :  { %7 = vrot.lane.b32.xlu0 %v55_v0, %s69_s10  ;;  %19 = vrot.lane.b32.xlu1 %v57_v1, %s70_s11  ;;  %v58_v3 = vld [vmem:[%s113_s0 + $0x4] sm:$0x1]   ;;  %v2_v4 = vld [vmem:[%s113_s0] sm:$0x1]   ;;  %s71_s18 = smov 48   ;;  %s72_s19 = smov 32  }
   0x3   :  { %4 = vst.msk [vmem:[#allocation0] sm:$0x1] %vm3_vm0, %v2_v4   ;;  %v59_v5 = vld [vmem:[%s113_s0 + $0x3] sm:$0x1]   ;;  %v60_v6 = vld [vmem:[%s113_s0 + $0x2] sm:$0x1]  }
   0x4   :  { %s73_s24 = smov 24   ;;  %s74_s25 = smov 16   ;;  %v61_v7 = vld [vmem:[%s113_s0 + $0x1] sm:$0x1]   ;;  %vm27_vm4 = vcmask 326912   ;;  %vm33_vm5 = vcmask 261312  }
   0x5   :  { %s75_s0 = smov 8   ;;  %vm39_vm6 = vcmask 195712   ;;  %vm45_vm7 = vcmask 130112  }
   0x6   :  { %13 = vrot.lane.b32.xlu0 %v56_v2, %s71_s18  ;;  %25 = vrot.lane.b32.xlu1 %v58_v3, %s72_s19 }
   0xa   :  { %31 = vrot.lane.b32.xlu0 %v59_v5, %s73_s24  ;;  %37 = vrot.lane.b32.xlu1 %v60_v6, %s74_s25 }
   0xe   :  { %43 = vrot.lane.b32.xlu0 %v61_v7, %s75_s0 }
  0x74   :  { %v8_v8 = vpop.permute.xlu0 %7   ;;  %v20_v9 = vpop.permute.xlu1 %19  }
  0x75   :  { %10 = vst.msk [vmem:[#allocation0] sm:$0x1] %vm9_vm1, %v8_v8  }
  0x78   :  { %v14_v10 = vpop.permute.xlu0 %13   ;;  %v26_v11 = vpop.permute.xlu1 %25  }
  0x79   :  { %16 = vst.msk [vmem:[#allocation0] sm:$0x1] %vm15_vm2, %v14_v10  }
  0x7a   :  { %22 = vst.msk [vmem:[#allocation0] sm:$0x1] %vm21_vm3, %v20_v9  }
  0x7b   :  { %28 = vst.msk [vmem:[#allocation0] sm:$0x1] %vm27_vm4, %v26_v11  }
  0x7c   :  { %v32_v12 = vpop.permute.xlu0 %31   ;;  %v38_v13 = vpop.permute.xlu1 %37  }
  0x7d   :  { %34 = vst.msk [vmem:[#allocation0] sm:$0x1] %vm33_vm5, %v32_v12  }
  0x7e   :  { %40 = vst.msk [vmem:[#allocation0] sm:$0x1] %vm39_vm6, %v38_v13  }
  0x80   :  { %v44_v14 = vpop.permute.xlu0 %43  }
  0x81   :  { %46 = vst.msk [vmem:[#allocation0] sm:$0x1] %vm45_vm7, %v44_v14  }
  0x88   :  { %v51_v15 = vld [vmem:[#allocation0] sm:$0x1] }
  0x89   :  { %54 = vst [vmem:[%s114_s1] sm:$0x1] %v51_v15 }

// kernel: conv_block_forward.1
= control target key start
LH: loop header
LB: loop body
LE: loop exit
PB: predicated region body
PF: predicated region fallthrough
CT: control target
= control target key end

     0   :  { %s4676_s18 = smov 0   ;;  %s5846_s0 = inlined_call_operand.vmem [shape: f32[2,8,8,32], index: 0, kind: input, shape index: {}]   ;;  %s5847_s1 = inlined_call_operand.vmem [shape: f32[9,40,64], index: 1, kind: input, shape index: {}]   ;;  %s5848_s2 = inlined_call_operand.vmem [shape: f32[9,80,64], index: 2, kind: input, shape index: {}]   ;;  %s5849_s3 = inlined_call_operand.vmem [shape: f32[1,64], index: 3, kind: input, shape index: {}]   ;;  %s5850_s4 = inlined_call_operand.vmem [shape: f32[1,64], index: 4, kind: input, shape index: {}]   ;;  %s5851_s5 = inlined_call_operand.vmem [shape: f32[2,4,4,32], index: 5, kind: output, shape index: {}]  }
   0x1 LB: > { %s3574_s19 = sadd.s32 4294967295, %s4638_s18   ;;  %p3578_p0 = scmp.ge.s32.totalorder %s4638_s18, 1  ;;  %s4638_s18 = sphi %s4676_s18, %s15_s18  }
   0x2   : > { %p187_p1 = scmp.lt.s32.totalorder %s4638_s18, 3 }
   0x4   : > { %p188_p2 = pnand %p3578_p0, %p187_p1 }
   0x6   : > { %191 = sbr.rel (%p188_p2) target bundleno = 1142 (0x476), region = 40 }
   0xb   : > { %p4684_p3 = scmp.lt.s32.totalorder %s3574_s19, 1  ;;  %v3587_v0 = vld [vmem:[%s5847_s1 + $0x48] sm:$0xff]  ;;  %v309_v1 = vld [vmem:[%s5847_s1 + $0x20] sm:$0xff]  ;;  %vm225_vm0 = vcmask 326656   ;;  %vm227_vm1 = vcmask 320512   ;;  %v4640_v2 = vmov 0.0  }
   0xc   : > { %4132 = vmatprep.subr.mxu0 %v3587_v0  ;;  %4154 = vmatprep.subr.mxu1 %v309_v1  ;;  %229 = vst.msk [vmem:[#allocation2 + $0x10] sm:$0xff] %vm225_vm0, %v4640_v2  ;;  %226 = vst.msk [vmem:[#allocation2] sm:$0xff] %vm225_vm0, %v4640_v2  ;;  %v3586_v3 = vld [vmem:[%s5847_s1 + $0x40] sm:$0xff]  ;;  %v308_v4 = vld [vmem:[%s5847_s1 + $0x18] sm:$0xff]  ;;  %s4641_s16 = smov 4   ;;  %vm288_vm2 = vcmask 293920  }
   0xd   : > { %231 = vst.msk [vmem:[#allocation2 + $0x20] sm:$0xff] %vm225_vm0, %v4640_v2  ;;  %233 = vst.msk [vmem:[#allocation2 + $0x30] sm:$0xff] %vm225_vm0, %v4640_v2  ;;  %s5872_s19 = smov (!%p4684_p3, %s3574_s19), 1  ;;  %4133 = vmatpush3.msra.mxu0 %v3587_v0  ;;  %4155 = vmatpush3.msra.mxu1 %v309_v1  ;;  %v3585_v5 = vld [vmem:[%s5847_s1 + $0x38] sm:$0xff]  ;;  %v307_v6 = vld [vmem:[%s5847_s1 + $0x10] sm:$0xff]  ;;  %vm1663_vm3 = vcmask 654336  }
   0xe   : > { %235 = vst.msk [vmem:[#allocation2 + $0x40] sm:$0xff] %vm225_vm0, %v4640_v2  ;;  %237 = vst.msk [vmem:[#allocation2 + $0x50] sm:$0xff] %vm225_vm0, %v4640_v2  ;;  %4134 = vmatprep.subr.mxu0 %v3586_v3  ;;  %4156 = vmatprep.subr.mxu1 %v308_v4  ;;  %s3851_s8 = sshll.u32 %s5872_s19, 6  ;;  %v3584_v7 = vld [vmem:[%s5847_s1 + $0x30] sm:$0xff]  ;;  %v306_v8 = vld [vmem:[%s5847_s1 + $0x8] sm:$0xff]  ;;  %vm1665_vm4 = vcmask 648192  }
   0xf   : > { %239 = vst.msk [vmem:[#allocation2 + $0x60] sm:$0xff] %vm225_vm0, %v4640_v2  ;;  %241 = vst.msk [vmem:[#allocation2 + $0x70] sm:$0xff] %vm225_vm0, %v4640_v2  ;;  %4135 = vmatpush3.msra.mxu0 %v3586_v3  ;;  %4157 = vmatpush3.msra.mxu1 %v308_v4  ;;  %s4754_s11 = scalar_lea.vmem %s5846_s0, %s3851_s8  ;;  %v3583_v11 = vld [vmem:[%s5847_s1 + $0x28] sm:$0xff]  ;;  %v305_v12 = vld [vmem:[%s5847_s1] sm:$0xff]  ;;  %s4642_s24 = smov 8   ;;  %vm1718_vm5 = vcmask 588864  }
  0x10   : > { %243 = vst.msk [vmem:[#allocation2 + $0x80] sm:$0xff] %vm225_vm0, %v4640_v2  ;;  %245 = vst.msk [vmem:[#allocation2 + $0x90] sm:$0xff] %vm225_vm0, %v4640_v2  ;;  %4136 = vmatprep.subr.mxu0 %v3585_v5  ;;  %4158 = vmatprep.subr.mxu1 %v307_v6  ;;  %v247_v9 = vld [vmem:[%s4754_s11] sm:$0xff]  ;;  %v249_v10 = vld [vmem:[%s4754_s11 + $0x10] sm:$0xff]  ;;  %vm3138_vm6 = vcmask 523264   ;;  %s4643_s25 = smov 120  }
  0x11   : > { %230 = vst.msk [vmem:[#allocation2 + $0x18] sm:$0x3] %vm227_vm1, %v4640_v2  ;;  %228 = vst.msk [vmem:[#allocation2 + $0x8] sm:$0x3] %vm227_vm1, %v4640_v2  ;;  %4137 = vmatpush3.msra.mxu0 %v3585_v5  ;;  %4159 = vmatpush3.msra.mxu1 %v307_v6  ;;  %v248_v13 = vld [vmem:[%s4754_s11 + $0x8] sm:$0xff]  ;;  %v250_v14 = vld [vmem:[%s4754_s11 + $0x18] sm:$0xff] }
  0x12   : > { %232 = vst.msk [vmem:[#allocation2 + $0x28] sm:$0x3] %vm227_vm1, %v4640_v2  ;;  %234 = vst.msk [vmem:[#allocation2 + $0x38] sm:$0x3] %vm227_vm1, %v4640_v2  ;;  %263 = vrot.lane.b32.xlu0 %v247_v9, %s4641_s16  ;;  %267 = vrot.lane.b32.xlu1 %v249_v10, %s4641_s16  ;;  %v3608_v17 = vld [vmem:[%s5847_s1 + $0x70] sm:$0xff]  ;;  %v3621_v18 = vld [vmem:[%s5847_s1 + $0x98] sm:$0xff] }
  0x13   : > { %236 = vst.msk [vmem:[#allocation2 + $0x48] sm:$0x3] %vm227_vm1, %v4640_v2  ;;  %238 = vst.msk [vmem:[#allocation2 + $0x58] sm:$0x3] %vm227_vm1, %v4640_v2  ;;  %4138 = vmatprep.subr.mxu0 %v3584_v7  ;;  %4160 = vmatprep.subr.mxu1 %v306_v8  ;;  %v297_v16 = vld [vmem:[#allocation2] sm:$0xff]  ;;  %v252_v20 = vld [vmem:[%s4754_s11 + $0x28] sm:$0xff] }
  0x14   : > { %240 = vst.msk [vmem:[#allocation2 + $0x68] sm:$0x3] %vm227_vm1, %v4640_v2  ;;  %242 = vst.msk [vmem:[#allocation2 + $0x78] sm:$0x3] %vm227_vm1, %v4640_v2  ;;  %4139 = vmatpush3.msra.mxu0 %v3584_v7  ;;  %4161 = vmatpush3.msra.mxu1 %v306_v8  ;;  %v251_v19 = vld [vmem:[%s4754_s11 + $0x20] sm:$0xff]  ;;  %v253_v21 = vld [vmem:[%s4754_s11 + $0x30] sm:$0xff] }
  0x15   : > { %244 = vst.msk [vmem:[#allocation2 + $0x88] sm:$0x3] %vm227_vm1, %v4640_v2  ;;  %246 = vst.msk [vmem:[#allocation2 + $0x98] sm:$0x3] %vm227_vm1, %v4640_v2  ;;  %4140 = vmatprep.subr.mxu0 %v3583_v11  ;;  %4162 = vmatprep.subr.mxu1 %v305_v12  ;;  %v254_v22 = vld [vmem:[%s4754_s11 + $0x38] sm:$0xff]  ;;  %v3607_v27 = vld [vmem:[%s5847_s1 + $0x68] sm:$0xff] }
  0x16   : > { %265 = vrot.lane.b32.xlu0 %v248_v13, %s4641_s16  ;;  %269 = vrot.lane.b32.xlu1 %v250_v14, %s4641_s16  ;;  %v3620_v32 = vld [vmem:[%s5847_s1 + $0x90] sm:$0xff]  ;;  %v3606_v35 = vld [vmem:[%s5847_s1 + $0x60] sm:$0xff]  ;;  %1669 = vst.msk [vmem:[#allocation3 + $0x20] sm:$0xff] %vm1663_vm3, %v4640_v2  ;;  %1664 = vst.msk [vmem:[#allocation3] sm:$0xff] %vm1663_vm3, %v4640_v2  ;;  %s4644_s26 = smov 112   ;;  %s4645_s27 = smov 104  }
  0x17   : > { %4141 = vmatpush3.msra.mxu0 %v3583_v11  ;;  %4163 = vmatpush3.msra.mxu1 %v305_v12  ;;  %v3605_v42 = vld [vmem:[%s5847_s1 + $0x58] sm:$0xff]  ;;  %v3619_v43 = vld [vmem:[%s5847_s1 + $0x88] sm:$0xff]  ;;  %v3604_v48 = vld [vmem:[%s5847_s1 + $0x50] sm:$0xff]  ;;  %1670 = vst.msk [vmem:[#allocation3 + $0x28] sm:$0x3] %vm1665_vm4, %v4640_v2  ;;  %vm3195_vm7 = vcmask 64512  }
  0x18   : > { %v310_v15 = vld [vmem:[#allocation2 + $0x1] sm:$0xff]  ;;  %4164 = vmatprep.mubr.msk.f32.mxu1 %vm225_vm0, %v297_v16  ;;  %4176 = vmatprep.subr.mxu0 %v3608_v17  ;;  %v3617_v52 = vld [vmem:[%s5847_s1 + $0x78] sm:$0xff]  ;;  %v3632_v60 = vld [vmem:[%s5847_s1 + $0xb0] sm:$0xff]  ;;  %1666 = vst.msk [vmem:[#allocation3 + $0x8] sm:$0x3] %vm1665_vm4, %v4640_v2  ;;  %vm3284_vm8 = vcmask 130112  }
  0x19   : > { %4142 = vmatprep.mubr.msk.f32.mxu0 %vm225_vm0, %v310_v15  ;;  %4198 = vmatprep.subr.mxu1 %v3621_v18  ;;  %v3618_v49 = vld [vmem:[%s5847_s1 + $0x80] sm:$0xff]  ;;  %v3633_v56 = vld [vmem:[%s5847_s1 + $0xb8] sm:$0xff]  ;;  %v3647_v57 = vld [vmem:[%s5847_s1 + $0xe8] sm:$0xff]  ;;  %1667 = vst.msk [vmem:[#allocation3 + $0x10] sm:$0xff] %vm1663_vm3, %v4640_v2  ;;  %vm3373_vm9 = vcmask 195712   ;;  %vm3462_vm10 = vcmask 261312  }
  0x1a   : > { %271 = vrot.lane.b32.xlu0 %v251_v19, %s4641_s16  ;;  %273 = vrot.lane.b32.xlu1 %v252_v20, %s4641_s16  ;;  %v582_v53 = vld [vmem:[#allocation2 + $0x2] sm:$0xff]  ;;  %v3645_v1 = vld [vmem:[%s5847_s1 + $0xd8] sm:$0xff]  ;;  %v3644_v6 = vld [vmem:[%s5847_s1 + $0xd0] sm:$0xff]  ;;  %1668 = vst.msk [vmem:[#allocation3 + $0x18] sm:$0x3] %vm1665_vm4, %v4640_v2  ;;  %s3852_s28 = sshll.u32 %s5872_s19, 4 }
  0x1b   : > { %v3634_v54 = vld [vmem:[%s5847_s1 + $0xc0] sm:$0xff]  ;;  %v3631_v0 = vld [vmem:[%s5847_s1 + $0xa8] sm:$0xff]  ;;  %v3660_v9 = vld [vmem:[%s5847_s1 + $0x110] sm:$0xff]  ;;  %1671 = vst.msk [vmem:[#allocation3 + $0x30] sm:$0xff] %vm1663_vm3, %v4640_v2  ;;  %s5817_s6 = scalar_lea.vmem %s5851_s5, %s3852_s28  ;;  %vm3514_vm11 = vcmask 257024  }
  0x1c   : > { %v3646_v61 = vld [vmem:[%s5847_s1 + $0xe0] sm:$0xff]  ;;  %v3643_v8 = vld [vmem:[%s5847_s1 + $0xc8] sm:$0xff]  ;;  %v3673_v11 = vld [vmem:[%s5847_s1 + $0x138] sm:$0xff]  ;;  %1672 = vst.msk [vmem:[#allocation3 + $0x38] sm:$0x3] %vm1665_vm4, %v4640_v2 }
  0x1d   : > { %v3630_v5 = vld [vmem:[%s5847_s1 + $0xa0] sm:$0xff]  ;;  %v3659_v10 = vld [vmem:[%s5847_s1 + $0x108] sm:$0xff]  ;;  %v3672_v13 = vld [vmem:[%s5847_s1 + $0x130] sm:$0xff]  ;;  %1673 = vst.msk [vmem:[#allocation3 + $0x40] sm:$0xff] %vm1663_vm3, %v4640_v2 }
  0x1e   : > { %275 = vrot.lane.b32.xlu0 %v253_v21, %s4641_s16  ;;  %277 = vrot.lane.b32.xlu1 %v254_v22, %s4641_s16  ;;  %v3658_v12 = vld [vmem:[%s5847_s1 + $0x100] sm:$0xff]  ;;  %v3657_v14 = vld [vmem:[%s5847_s1 + $0xf8] sm:$0xff]  ;;  %1674 = vst.msk [vmem:[#allocation3 + $0x48] sm:$0x3] %vm1665_vm4, %v4640_v2  ;;  %1676 = vst.msk [vmem:[#allocation3 + $0x58] sm:$0x3] %vm1665_vm4, %v4640_v2 }
  0x1f   : > { %v3671_v15 = vld [vmem:[%s5847_s1 + $0x128] sm:$0xff]  ;;  %v3656_v16 = vld [vmem:[%s5847_s1 + $0xf0] sm:$0xff]  ;;  %v3669_v20 = vld [vmem:[%s5847_s1 + $0x118] sm:$0xff]  ;;  %1675 = vst.msk [vmem:[#allocation3 + $0x50] sm:$0xff] %vm1663_vm3, %v4640_v2 }
  0x20   : > { %v3686_v21 = vld [vmem:[%s5847_s1 + $0x160] sm:$0xff]  ;;  %v3685_v22 = vld [vmem:[%s5847_s1 + $0x158] sm:$0xff]  ;;  %1677 = vst.msk [vmem:[#allocation3 + $0x60] sm:$0xff] %vm1663_vm3, %v4640_v2  ;;  %1679 = vst.msk [vmem:[#allocation3 + $0x70] sm:$0xff] %vm1663_vm3, %v4640_v2 }
  0x21   : > { %1678 = vst.msk [vmem:[#allocation3 + $0x68] sm:$0x3] %vm1665_vm4, %v4640_v2  ;;  %1680 = vst.msk [vmem:[#allocation3 + $0x78] sm:$0x3] %vm1665_vm4, %v4640_v2 }
  0x22   : > { %1681 = vst.msk [vmem:[#allocation3 + $0x80] sm:$0xff] %vm1663_vm3, %v4640_v2  ;;  %1683 = vst.msk [vmem:[#allocation3 + $0x90] sm:$0xff] %vm1663_vm3, %v4640_v2 }
  0x23   : > { %1682 = vst.msk [vmem:[#allocation3 + $0x88] sm:$0x3] %vm1665_vm4, %v4640_v2  ;;  %1684 = vst.msk [vmem:[#allocation3 + $0x98] sm:$0x3] %vm1665_vm4, %v4640_v2  ;;  %v1741_v2 = vld [vmem:[%s5848_s2 + $0x30] sm:$0xff] }
  0x84   : > { %v264_v23 = vpop.permute.xlu0 %263  ;;  %v268_v24 = vpop.permute.xlu1 %267 }
  0x85   : > { %289 = vst.msk [vmem:[#allocation2 + $0x11] sm:$0xff] %vm288_vm2, %v264_v23  ;;  %291 = vst.msk [vmem:[#allocation2 + $0x31] sm:$0xff] %vm288_vm2, %v268_v24  ;;  %v3684_v23 = vld [vmem:[%s5847_s1 + $0x150] sm:$0xff]  ;;  %v3683_v24 = vld [vmem:[%s5847_s1 + $0x148] sm:$0xff] }
  0x88   : > { %v266_v25 = vpop.permute.xlu0 %265  ;;  %v270_v26 = vpop.permute.xlu1 %269 }
  0x89   : > { %290 = vst.msk [vmem:[#allocation2 + $0x21] sm:$0xff] %vm288_vm2, %v266_v25  ;;  %292 = vst.msk [vmem:[#allocation2 + $0x41] sm:$0xff] %vm288_vm2, %v270_v26  ;;  %v1194_v25 = vld [vmem:[#allocation2 + $0x90] sm:$0xff]  ;;  %v3682_v26 = vld [vmem:[%s5847_s1 + $0x140] sm:$0xff] }
  0x8c   : > { %v4799_v28 = vld [vmem:[#allocation2 + $0x11] sm:$0xff]  ;;  %v272_v30 = vpop.permute.xlu0 %271  ;;  %v274_v31 = vpop.permute.xlu1 %273 }
  0x8d   : > { %v298_v29 = vld [vmem:[#allocation2 + $0x10] sm:$0xff]  ;;  %4143 = vmatmul.mubr.msk.f32.vlgmr.msra.gmra.mxu0 %vm225_vm0, %v4799_v28  ;;  %293 = vst.msk [vmem:[#allocation2 + $0x51] sm:$0xff] %vm288_vm2, %v272_v30  ;;  %294 = vst.msk [vmem:[#allocation2 + $0x61] sm:$0xff] %vm288_vm2, %v274_v31  ;;  %v1744_v30 = vld [vmem:[%s5848_s2 + $0x48] sm:$0xff] }
  0x8e   : > { %4165 = vmatmul.mubr.msk.f32.vlgmr.msra.gmra.mxu1 %vm225_vm0, %v298_v29  ;;  %4177 = vmatpush3.msra.mxu0 %v3608_v17  ;;  %v4809_v33 = vld [vmem:[#allocation2 + $0x31] sm:$0xff]  ;;  %v3670_v17 = vld [vmem:[%s5847_s1 + $0x120] sm:$0xff] }
  0x8f   : > { %4199 = vmatpush3.msra.mxu1 %v3621_v18  ;;  %4178 = vmatprep.subr.mxu0 %v3607_v27  ;;  %v4811_v34 = vld [vmem:[#allocation2 + $0x30] sm:$0xff] }
  0x90   : > { %4200 = vmatprep.subr.mxu1 %v3620_v32  ;;  %v4816_v36 = vld [vmem:[#allocation2 + $0x21] sm:$0xff]  ;;  %v276_v38 = vpop.permute.xlu0 %275  ;;  %4179 = vmatpush3.msra.mxu0 %v3607_v27  ;;  %v278_v40 = vpop.permute.xlu1 %277  ;;  %v583_v55 = vld [vmem:[#allocation2 + $0x12] sm:$0xff] }
  0x91   : > { %v4818_v37 = vld [vmem:[#allocation2 + $0x20] sm:$0xff]  ;;  %4201 = vmatpush3.msra.mxu1 %v3620_v32  ;;  %4145 = vmatprep.mubr.msk.f32.mxu0 %vm225_vm0, %v4816_v36  ;;  %295 = vst.msk [vmem:[#allocation2 + $0x71] sm:$0xff] %vm288_vm2, %v276_v38  ;;  %296 = vst.msk [vmem:[#allocation2 + $0x81] sm:$0xff] %vm288_vm2, %v278_v40  ;;  %v4897_v59 = vld [vmem:[#allocation2 + $0x32] sm:$0xff] }
  0x92   : > { %v4820_v39 = vld [vmem:[#allocation2 + $0x41] sm:$0xff]  ;;  %4167 = vmatprep.mubr.msk.f32.mxu1 %vm225_vm0, %v4818_v37  ;;  %4146 = vmatmul.mubr.msk.f32.gmra.mxu0 %vm225_vm0, %v4809_v33  ;;  %v1345_v27 = vld [vmem:[#allocation2 + $0x91] sm:$0xff] }
  0x93   : > { %v4827_v41 = vld [vmem:[#allocation2 + $0x40] sm:$0xff]  ;;  %4168 = vmatmul.mubr.msk.f32.gmra.mxu1 %vm225_vm0, %v4811_v34  ;;  %4180 = vmatprep.subr.mxu0 %v3606_v35  ;;  %v3704_v31 = vld [vmem:[%s5848_s2 + $0x90] sm:$0xff] }
  0x94   : > { %4148 = vmatprep.mubr.msk.f32.mxu0 %vm225_vm0, %v4820_v39  ;;  %4170 = vmatprep.mubr.msk.f32.mxu1 %vm225_vm0, %v4827_v41  ;;  %v4844_v44 = vld [vmem:[#allocation2 + $0x51] sm:$0xff]  ;;  %v4848_v46 = vld [vmem:[#allocation2 + $0x61] sm:$0xff] }
  0x95   : > { %4181 = vmatpush3.msra.mxu0 %v3606_v35  ;;  %v4846_v45 = vld [vmem:[#allocation2 + $0x50] sm:$0xff]  ;;  %4202 = vmatprep.subr.mxu1 %v3619_v43  ;;  %v4850_v47 = vld [vmem:[#allocation2 + $0x60] sm:$0xff] }
  0x96   : > { %4182 = vmatprep.subr.mxu0 %v3605_v42  ;;  %4149 = vmatmul.mubr.msk.f32.gmra.mxu0 %vm225_vm0, %v4844_v44  ;;  %v4891_v58 = vld [vmem:[#allocation2 + $0x22] sm:$0xff]  ;;  %v4915_v63 = vld [vmem:[#allocation2 + $0x52] sm:$0xff] }
  0x97   : > { %4171 = vmatmul.mubr.msk.f32.gmra.mxu1 %vm225_vm0, %v4846_v45  ;;  %4183 = vmatpush3.msra.mxu0 %v3605_v42  ;;  %v4909_v62 = vld [vmem:[#allocation2 + $0x42] sm:$0xff]  ;;  %v3700_v38 = vld [vmem:[%s5848_s2 + $0x70] sm:$0xff] }
  0x98   : > { %4151 = vmatprep.mubr.msk.f32.mxu0 %vm225_vm0, %v4848_v46  ;;  %4173 = vmatprep.mubr.msk.f32.mxu1 %vm225_vm0, %v4850_v47  ;;  %v4866_v50 = vld [vmem:[#allocation2 + $0x71] sm:$0xff]  ;;  %v4927_v3 = vld [vmem:[#allocation2 + $0x62] sm:$0xff] }
  0x99   : > { %4203 = vmatpush3.msra.mxu1 %v3619_v43  ;;  %v4868_v51 = vld [vmem:[#allocation2 + $0x70] sm:$0xff]  ;;  %4184 = vmatprep.subr.mxu0 %v3604_v48  ;;  %v4933_v4 = vld [vmem:[#allocation2 + $0x80] sm:$0xff] }
  0x9a   : > { %4204 = vmatprep.subr.mxu1 %v3618_v49  ;;  %4152 = vmatmul.mubr.msk.f32.gmra.mxu0 %vm225_vm0, %v4866_v50  ;;  %v4941_v7 = vld [vmem:[#allocation2 + $0x72] sm:$0xff]  ;;  %v891_v18 = vld [vmem:[#allocation2 + $0x81] sm:$0xff] }
  0x9b   : > { %4174 = vmatmul.mubr.msk.f32.gmra.mxu1 %vm225_vm0, %v4868_v51  ;;  %4185 = vmatpush3.msra.mxu0 %v3604_v48  ;;  %v1042_v19 = vld [vmem:[#allocation2 + $0x82] sm:$0xff] }
  0x9c   : > { %4205 = vmatpush3.msra.mxu1 %v3618_v49  ;;  %4208 = vmatprep.mubr.msk.f32.mxu1 %vm225_vm0, %v298_v29  ;;  %v3705_v29 = vld [vmem:[%s5848_s2 + $0x98] sm:$0xff]  ;;  %v1743_v32 = vld [vmem:[%s5848_s2 + $0x40] sm:$0xff] }
  0x9d   : > { %4206 = vmatprep.subr.mxu1 %v3617_v52  ;;  %4186 = vmatprep.mubr.msk.f32.mxu0 %vm225_vm0, %v582_v53  ;;  %v3702_v35 = vld [vmem:[%s5848_s2 + $0x80] sm:$0xff] }
  0x9e   : > { %4207 = vmatpush3.msra.mxu1 %v3617_v52  ;;  %4220 = vmatprep.subr.mxu0 %v3634_v54 }
  0x9f   : > { %4187 = vmatmul.mubr.msk.f32.vlgmr.msra.gmra.mxu0 %vm225_vm0, %v583_v55  ;;  %4209 = vmatmul.mubr.msk.f32.vlgmr.msra.gmra.mxu1 %vm225_vm0, %v4818_v37 }
  0xa0   : > { %4221 = vmatpush3.msra.mxu0 %v3634_v54  ;;  %4189 = vmatprep.mubr.msk.f32.mxu0 %vm225_vm0, %v4891_v58 }
  0xa1   : > { %4211 = vmatprep.mubr.msk.f32.mxu1 %vm225_vm0, %v4811_v34  ;;  %4222 = vmatprep.subr.mxu0 %v3633_v56 }
  0xa2   : > { %4242 = vmatprep.subr.mxu1 %v3647_v57  ;;  %4223 = vmatpush3.msra.mxu0 %v3633_v56 }
  0xa3   : > { %4190 = vmatmul.mubr.msk.f32.gmra.mxu0 %vm225_vm0, %v4897_v59  ;;  %4243 = vmatpush3.msra.mxu1 %v3647_v57 }
  0xa4   : > { %4212 = vmatmul.mubr.msk.f32.gmra.mxu1 %vm225_vm0, %v4827_v41  ;;  %4192 = vmatprep.mubr.msk.f32.mxu0 %vm225_vm0, %v4909_v62 }
  0xa5   : > { %4214 = vmatprep.mubr.msk.f32.mxu1 %vm225_vm0, %v4846_v45  ;;  %4224 = vmatprep.subr.mxu0 %v3632_v60 }
  0xa6   : > { %4244 = vmatprep.subr.mxu1 %v3646_v61  ;;  %4225 = vmatpush3.msra.mxu0 %v3632_v60 }
  0xa7   : > { %4245 = vmatpush3.msra.mxu1 %v3646_v61  ;;  %4193 = vmatmul.mubr.msk.f32.gmra.mxu0 %vm225_vm0, %v4915_v63 }
  0xa8   : > { %4215 = vmatmul.mubr.msk.f32.gmra.mxu1 %vm225_vm0, %v4850_v47  ;;  %4195 = vmatprep.mubr.msk.f32.mxu0 %vm225_vm0, %v4927_v3 }
  0xa9   : > { %4217 = vmatprep.mubr.msk.f32.mxu1 %vm225_vm0, %v4868_v51  ;;  %4226 = vmatprep.subr.mxu0 %v3631_v0 }
  0xaa   : > { %4246 = vmatprep.subr.mxu1 %v3645_v1  ;;  %4227 = vmatpush3.msra.mxu0 %v3631_v0 }
  0xab   : > { %4247 = vmatpush3.msra.mxu1 %v3645_v1  ;;  %4196 = vmatmul.mubr.msk.f32.gmra.mxu0 %vm225_vm0, %v4941_v7 }
  0xac   : > { %4218 = vmatmul.mubr.msk.f32.gmra.mxu1 %vm225_vm0, %v4933_v4  ;;  %4228 = vmatprep.subr.mxu0 %v3630_v5 }
  0xad   : > { %4248 = vmatprep.subr.mxu1 %v3644_v6  ;;  %4229 = vmatpush3.msra.mxu0 %v3630_v5 }
  0xae   : > { %4230 = vmatprep.mubr.msk.f32.mxu0 %vm225_vm0, %v4799_v28  ;;  %4249 = vmatpush3.msra.mxu1 %v3644_v6  ;;  %v1496_v28 = vld [vmem:[#allocation2 + $0x92] sm:$0xff] }
  0xaf   : > { %4252 = vmatprep.mubr.msk.f32.mxu1 %vm225_vm0, %v583_v55  ;;  %4250 = vmatprep.subr.mxu1 %v3643_v8 }
  0xb0   : > { %4264 = vmatprep.subr.mxu0 %v3660_v9  ;;  %4251 = vmatpush3.msra.mxu1 %v3643_v8 }
  0xb1   : > { %4231 = vmatmul.mubr.msk.f32.vlgmr.msra.gmra.mxu0 %vm225_vm0, %v4816_v36  ;;  %4253 = vmatmul.mubr.msk.f32.vlgmr.msra.gmra.mxu1 %vm225_vm0, %v4891_v58 }
  0xb2   : > { %4265 = vmatpush3.msra.mxu0 %v3660_v9  ;;  %4233 = vmatprep.mubr.msk.f32.mxu0 %vm225_vm0, %v4809_v33 }
  0xb3   : > { %4255 = vmatprep.mubr.msk.f32.mxu1 %vm225_vm0, %v4897_v59  ;;  %4266 = vmatprep.subr.mxu0 %v3659_v10 }
  0xb4   : > { %4286 = vmatprep.subr.mxu1 %v3673_v11  ;;  %4267 = vmatpush3.msra.mxu0 %v3659_v10 }
  0xb5   : > { %4234 = vmatmul.mubr.msk.f32.gmra.mxu0 %vm225_vm0, %v4820_v39  ;;  %4287 = vmatpush3.msra.mxu1 %v3673_v11 }
  0xb6   : > { %4256 = vmatmul.mubr.msk.f32.gmra.mxu1 %vm225_vm0, %v4909_v62  ;;  %4236 = vmatprep.mubr.msk.f32.mxu0 %vm225_vm0, %v4844_v44 }
  0xb7   : > { %4258 = vmatprep.mubr.msk.f32.mxu1 %vm225_vm0, %v4915_v63  ;;  %4268 = vmatprep.subr.mxu0 %v3658_v12 }
  0xb8   : > { %4288 = vmatprep.subr.mxu1 %v3672_v13  ;;  %4269 = vmatpush3.msra.mxu0 %v3658_v12 }
  0xb9   : > { %4289 = vmatpush3.msra.mxu1 %v3672_v13  ;;  %4237 = vmatmul.mubr.msk.f32.gmra.mxu0 %vm225_vm0, %v4848_v46 }
  0xba   : > { %4259 = vmatmul.mubr.msk.f32.gmra.mxu1 %vm225_vm0, %v4927_v3  ;;  %4239 = vmatprep.mubr.msk.f32.mxu0 %vm225_vm0, %v4866_v50 }
  0xbb   : > { %4261 = vmatprep.mubr.msk.f32.mxu1 %vm225_vm0, %v4941_v7  ;;  %4270 = vmatprep.subr.mxu0 %v3657_v14 }
  0xbc   : > { %4290 = vmatprep.subr.mxu1 %v3671_v15  ;;  %4271 = vmatpush3.msra.mxu0 %v3657_v14 }
  0xbd   : > { %4291 = vmatpush3.msra.mxu1 %v3671_v15  ;;  %4240 = vmatmul.mubr.msk.f32.gmra.mxu0 %vm225_vm0, %v891_v18 }
  0xbe   : > { %4262 = vmatmul.mubr.msk.f32.gmra.mxu1 %vm225_vm0, %v1042_v19  ;;  %4272 = vmatprep.subr.mxu0 %v3656_v16 }
  0xbf   : > { %4292 = vmatprep.subr.mxu1 %v3670_v17  ;;  %4273 = vmatpush3.msra.mxu0 %v3656_v16 }
  0xc0   : > { %4274 = vmatprep.mubr.msk.f32.mxu0 %vm225_vm0, %v4818_v37  ;;  %4293 = vmatpush3.msra.mxu1 %v3670_v17  ;;  %v1740_v37 = vld [vmem:[%s5848_s2 + $0x28] sm:$0xff] }
  0xc1   : > { %4296 = vmatprep.mubr.msk.f32.mxu1 %vm225_vm0, %v4816_v36  ;;  %4294 = vmatprep.subr.mxu1 %v3669_v20  ;;  %v3701_v36 = vld [vmem:[%s5848_s2 + $0x78] sm:$0xff] }
  0xc2   : > { %4308 = vmatprep.subr.mxu0 %v3686_v21  ;;  %4295 = vmatpush3.msra.mxu1 %v3669_v20 }
  0xc3   : > { %4275 = vmatmul.mubr.msk.f32.vlgmr.msra.gmra.mxu0 %vm225_vm0, %v4811_v34  ;;  %4297 = vmatmul.mubr.msk.f32.vlgmr.msra.gmra.mxu1 %vm225_vm0, %v4809_v33  ;;  %v3703_v33 = vld [vmem:[%s5848_s2 + $0x88] sm:$0xff]  ;;  %v1742_v34 = vld [vmem:[%s5848_s2 + $0x38] sm:$0xff] }
  0xc4   : > { %4309 = vmatpush3.msra.mxu0 %v3686_v21  ;;  %4277 = vmatprep.mubr.msk.f32.mxu0 %vm225_vm0, %v4827_v41 }
  0xc5   : > { %4299 = vmatprep.mubr.msk.f32.mxu1 %vm225_vm0, %v4820_v39  ;;  %4310 = vmatprep.subr.mxu0 %v3685_v22  ;;  %v1739_v39 = vld [vmem:[%s5848_s2 + $0x20] sm:$0xff] }
  0xc6   : > { %4311 = vmatpush3.msra.mxu0 %v3685_v22  ;;  %4330 = vmatprep.subr.mxu1 %v3705_v29 }
  0xc7   : > { %4278 = vmatmul.mubr.msk.f32.gmra.mxu0 %vm225_vm0, %v4846_v45  ;;  %4300 = vmatmul.mubr.msk.f32.gmra.mxu1 %vm225_vm0, %v4844_v44 }
  0xc8   : > { %4280 = vmatprep.mubr.msk.f32.mxu0 %vm225_vm0, %v4850_v47  ;;  %4302 = vmatprep.mubr.msk.f32.mxu1 %vm225_vm0, %v4848_v46 }
  0xc9   : > { %4312 = vmatprep.subr.mxu0 %v3684_v23  ;;  %4331 = vmatpush3.msra.mxu1 %v3705_v29 }
  0xca   : > { %4313 = vmatpush3.msra.mxu0 %v3684_v23  ;;  %4332 = vmatprep.subr.mxu1 %v3704_v31 }
  0xcb   : > { %4281 = vmatmul.mubr.msk.f32.gmra.mxu0 %vm225_vm0, %v4868_v51  ;;  %4303 = vmatmul.mubr.msk.f32.gmra.mxu1 %vm225_vm0, %v4866_v50 }
  0xcc   : > { %4283 = vmatprep.mubr.msk.f32.mxu0 %vm225_vm0, %v4933_v4  ;;  %4305 = vmatprep.mubr.msk.f32.mxu1 %vm225_vm0, %v891_v18 }
  0xcd   : > { %4314 = vmatprep.subr.mxu0 %v3683_v24  ;;  %4333 = vmatpush3.msra.mxu1 %v3704_v31 }
  0xce   : > { %4315 = vmatpush3.msra.mxu0 %v3683_v24  ;;  %4334 = vmatprep.subr.mxu1 %v3703_v33 }
  0xcf   : > { %4284 = vmatmul.mubr.msk.f32.gmra.mxu0 %vm225_vm0, %v1194_v25  ;;  %4316 = vmatprep.subr.mxu0 %v3682_v26 }
  0xd0   : > { %4317 = vmatpush3.msra.mxu0 %v3682_v26  ;;  %4318 = vmatprep.mubr.msk.f32.mxu0 %vm225_vm0, %v4891_v58 }
  0xd1   : > { %4306 = vmatmul.mubr.msk.f32.gmra.mxu1 %vm225_vm0, %v1345_v27  ;;  %4362 = vmatprep.subr.mxu0 %v1744_v30 }
  0xd2   : > { %4335 = vmatpush3.msra.mxu1 %v3703_v33 }
  0xd3   : > { %4319 = vmatmul.mubr.msk.f32.vlgmr.msra.gmra.mxu0 %vm225_vm0, %v4897_v59  ;;  %4336 = vmatprep.subr.mxu1 %v3702_v35 }
  0xd4   : > { %4321 = vmatprep.mubr.msk.f32.mxu0 %vm225_vm0, %v4909_v62  ;;  %4363 = vmatpush3.msra.mxu0 %v1744_v30 }
  0xd5   : > { %4364 = vmatprep.subr.mxu0 %v1743_v32  ;;  %4337 = vmatpush3.msra.mxu1 %v3702_v35 }
  0xd6   : > { %4365 = vmatpush3.msra.mxu0 %v1743_v32  ;;  %4338 = vmatprep.subr.mxu1 %v3701_v36 }
  0xd7   : > { %4322 = vmatmul.mubr.msk.f32.gmra.mxu0 %vm225_vm0, %v4915_v63  ;;  %4366 = vmatprep.subr.mxu0 %v1742_v34 }
  0xd8   : > { %4324 = vmatprep.mubr.msk.f32.mxu0 %vm225_vm0, %v4927_v3  ;;  %4367 = vmatpush3.msra.mxu0 %v1742_v34 }
  0xd9   : > { %4368 = vmatprep.subr.mxu0 %v1741_v2  ;;  %4339 = vmatpush3.msra.mxu1 %v3701_v36 }
  0xda   : > { %4369 = vmatpush3.msra.mxu0 %v1741_v2  ;;  %4340 = vmatprep.subr.mxu1 %v3700_v38 }
  0xdb   : > { %4325 = vmatmul.mubr.msk.f32.gmra.mxu0 %vm225_vm0, %v4941_v7  ;;  %4370 = vmatprep.subr.mxu0 %v1740_v37 }
  0xdc   : > { %4327 = vmatprep.mubr.msk.f32.mxu0 %vm225_vm0, %v1042_v19  ;;  %4371 = vmatpush3.msra.mxu0 %v1740_v37 }
  0xdd   : > { %4372 = vmatprep.subr.mxu0 %v1739_v39  ;;  %4341 = vmatpush3.msra.mxu1 %v3700_v38 }
  0xde   : > { %4373 = vmatpush3.msra.mxu0 %v1739_v39 }
  0xdf   : > { %4328 = vmatmul.mubr.msk.f32.gmra.mxu0 %vm225_vm0, %v1496_v28 }
 0x14d   : > { %v4144_v40 = vpop.f32.mrf.mxu0 }
 0x14e   : > { %v4166_v41 = vpop.f32.mrf.mxu1 }
 0x14f   : > { %v414_v42 = vpop.f32.mrf.mxu0  ;;  %v549_v25 = vadd.f32 %v4166_v41, %v4144_v40 }
 0x150   : > { %v543_v43 = vpop.f32.mrf.mxu1 }
 0x151   : > { %v544_v26 = vadd.f32 %v543_v43, %v414_v42 }
 0x152   : > { %v4147_v44 = vpop.f32.mrf.mxu0 }
 0x153   : > { %v4169_v45 = vpop.f32.mrf.mxu1 }
 0x154   : > { %v424_v46 = vpop.f32.mrf.mxu0  ;;  %v559_v30 = vadd.f32 %v4169_v45, %v4147_v44 }
 0x155   : > { %v553_v47 = vpop.f32.mrf.mxu1 }
 0x156   : > { %v4150_v48 = vpop.f32.mrf.mxu0  ;;  %v554_v33 = vadd.f32 %v553_v47, %v424_v46 }
 0x157   : > { %v4172_v49 = vpop.f32.mrf.mxu1 }
 0x158   : > { %v434_v50 = vpop.f32.mrf.mxu0  ;;  %v569_v36 = vadd.f32 %v4172_v49, %v4150_v48 }
 0x159   : > { %v563_v51 = vpop.f32.mrf.mxu1 }
 0x15a   : > { %v4153_v52 = vpop.f32.mrf.mxu0 }
 0x15b   : > { %v4175_v53 = vpop.f32.mrf.mxu1 }
 0x15c   : > { %v5143_v54 = vpop.f32.mrf.mxu0  ;;  %v579_v42 = vadd.f32 %v4175_v53, %v4153_v52 }
 0x15d   : > { %v573_v55 = vpop.f32.mrf.mxu1 }
 0x15f   : > { %v4188_v56 = vpop.f32.mrf.mxu0  ;;  %v4210_v57 = vpop.f32.mrf.mxu1 }
 0x160   : > { %v726_v27 = vadd.f32 %v4188_v56, %v549_v25 }
 0x161   : > { %v686_v58 = vpop.f32.mrf.mxu0  ;;  %v837_v59 = vpop.f32.mrf.mxu1 }
 0x162   : > { %v725_v31 = vadd.f32 %v686_v58, %v544_v26  ;;  %v877_v34 = vadd.f32 %v4210_v57, %v726_v27  ;;  %v574_v57 = vadd.f32 %v573_v55, %v5143_v54 }
 0x163   : > { %v4191_v60 = vpop.f32.mrf.mxu0 }
 0x164   : > { %v4213_v61 = vpop.f32.mrf.mxu1  ;;  %v728_v35 = vadd.f32 %v4191_v60, %v559_v30  ;;  %v876_v38 = vadd.f32 %v837_v59, %v725_v31  ;;  %v1745_v30 = vld [vmem:[#allocation3 + $0x1] sm:$0xff] }
 0x165   : > { %v696_v62 = vpop.f32.mrf.mxu0  ;;  %v1727_v31 = vld [vmem:[#allocation3] sm:$0xff]  ;;  %4350 = vmatprep.mubr.msk.f32.mxu1 %vm1663_vm3, %v1745_v30 }
 0x166   : > { %v847_v63 = vpop.f32.mrf.mxu1  ;;  %v727_v39 = vadd.f32 %v696_v62, %v554_v33  ;;  %v879_v40 = vadd.f32 %v4213_v61, %v728_v35  ;;  %4382 = vmatprep.mubr.msk.f32.mxu0 %vm1663_vm3, %v1727_v31  ;;  %v5218_v35 = vld [vmem:[%s5848_s2 + $0x138] sm:$0xff] }
 0x167   : > { %v4194_v0 = vpop.f32.mrf.mxu0 }
 0x168   : > { %v4216_v1 = vpop.f32.mrf.mxu1  ;;  %v878_v45 = vadd.f32 %v847_v63, %v727_v39  ;;  %v3698_v63 = vld [vmem:[%s5848_s2 + $0x60] sm:$0xff] }
 0x169   : > { %v706_v3 = vpop.f32.mrf.mxu0 }
 0x16a   : > { %v857_v4 = vpop.f32.mrf.mxu1 }
 0x16b   : > { %v4197_v5 = vpop.f32.mrf.mxu0 }
 0x16c   : > { %v5145_v6 = vpop.f32.mrf.mxu1  ;;  %v732_v49 = vadd.f32 %v4197_v5, %v579_v42 }
 0x16d   : > { %v716_v7 = vpop.f32.mrf.mxu0 }
 0x16e   : > { %v5147_v8 = vpop.f32.mrf.mxu1  ;;  %v731_v61 = vadd.f32 %v716_v7, %v574_v57 }
 0x171   : > { %v4232_v9 = vpop.f32.mrf.mxu0  ;;  %v4254_v10 = vpop.f32.mrf.mxu1 }
 0x173   : > { %v988_v11 = vpop.f32.mrf.mxu0  ;;  %v1139_v12 = vpop.f32.mrf.mxu1 }
 0x174   : > { %v1027_v41 = vadd.f32 %v988_v11, %v876_v38 }
 0x175   : > { %v4235_v13 = vpop.f32.mrf.mxu0 }
 0x176   : > { %v4257_v14 = vpop.f32.mrf.mxu1  ;;  %v1030_v47 = vadd.f32 %v4235_v13, %v879_v40  ;;  %v1178_v52 = vadd.f32 %v1139_v12, %v1027_v41 }
 0x177   : > { %v998_v15 = vpop.f32.mrf.mxu0 }
 0x178   : > { %v5149_v16 = vpop.f32.mrf.mxu1  ;;  %v1029_v53 = vadd.f32 %v998_v15, %v878_v45 }
 0x179   : > { %v4238_v17 = vpop.f32.mrf.mxu0 }
 0x17a   : > { %v5151_v18 = vpop.f32.mrf.mxu1  ;;  %v1180_v11 = vadd.f32 %v5149_v16, %v1029_v53  ;;  %v3696_v16 = vld [vmem:[%s5848_s2 + $0x50] sm:$0xff] }
 0x17b   : > { %v1008_v19 = vpop.f32.mrf.mxu0 }
 0x17c   : > { %v5153_v20 = vpop.f32.mrf.mxu1 }
 0x17d   : > { %5853 = vst [vmem:[#allocation6_spill] sm:$0xff] %v5153_v20  ;;  %v5155_v21 = vpop.f32.mrf.mxu0  ;;  %v564_v20 = vadd.f32 %v563_v51, %v434_v50  ;;  %v3699_v50 = vld [vmem:[%s5848_s2 + $0x68] sm:$0xff]  ;;  %v1738_v51 = vld [vmem:[%s5848_s2 + $0x18] sm:$0xff] }
 0x17e   : > { %v5157_v22 = vpop.f32.mrf.mxu1  ;;  %4342 = vmatprep.subr.mxu1 %v3699_v50  ;;  %4374 = vmatprep.subr.mxu0 %v1738_v51 }
 0x17f   : > { %5854 = vst [vmem:[#allocation7_spill] sm:$0xff] %v5157_v22  ;;  %v5159_v23 = vpop.f32.mrf.mxu0  ;;  %v1028_v22 = vadd.f32 %v4232_v9, %v877_v34  ;;  %v729_v43 = vadd.f32 %v706_v3, %v564_v20  ;;  %4343 = vmatpush3.msra.mxu1 %v3699_v50  ;;  %4375 = vmatpush3.msra.mxu0 %v1738_v51  ;;  %v3697_v9 = vld [vmem:[%s5848_s2 + $0x58] sm:$0xff]  ;;  %v5196_v20 = vld [vmem:[%s5849_s3] ss:$0 sm:$0xff] }
 0x180   : > { %5855 = vst [vmem:[#allocation8_spill] sm:$0xff] %v5159_v23  ;;  %v5161_v24 = vpop.f32.mrf.mxu1  ;;  %4344 = vmatprep.subr.mxu1 %v3698_v63 }
 0x181   : > { %5856 = vst [vmem:[#allocation9_spill] sm:$0xff] %v5161_v24  ;;  %v730_v24 = vadd.f32 %v4194_v0, %v569_v36  ;;  %v1179_v46 = vadd.f32 %v4254_v10, %v1028_v22  ;;  %v880_v60 = vadd.f32 %v857_v4, %v729_v43  ;;  %v1737_v0 = vld [vmem:[%s5848_s2 + $0x10] sm:$0xff]  ;;  %v883_v4 = vadd.f32 %v5145_v6, %v732_v49  ;;  %v1736_v10 = vld [vmem:[%s5848_s2 + $0x8] sm:$0xff] }
 0x182   : > { %4376 = vmatprep.subr.mxu0 %v1737_v0  ;;  %4345 = vmatpush3.msra.mxu1 %v3698_v63  ;;  %v882_v6 = vadd.f32 %v5147_v8, %v731_v61  ;;  %v1735_v8 = vld [vmem:[%s5848_s2] sm:$0xff] }
 0x183   : > { %v4276_v28 = vpop.f32.mrf.mxu0  ;;  %v4298_v29 = vpop.f32.mrf.mxu1  ;;  %v881_v48 = vadd.f32 %v4216_v1, %v730_v24  ;;  %v1181_v1 = vadd.f32 %v4257_v14, %v1030_v47  ;;  %v1031_v5 = vadd.f32 %v1008_v19, %v880_v60  ;;  %4377 = vmatpush3.msra.mxu0 %v1737_v0  ;;  %4346 = vmatprep.subr.mxu1 %v3697_v9 }
 0x184   : > { %v1331_v59 = vadd.f32 %v4276_v28, %v1179_v46  ;;  %4378 = vmatprep.subr.mxu0 %v1736_v10  ;;  %v1034_v15 = vadd.f32 %v5155_v21, %v883_v4  ;;  %4347 = vmatpush3.msra.mxu1 %v3697_v9  ;;  %v5857_v24 = vld [vmem:[#allocation6_spill] sm:$0xff] }
 0x185   : > { %v1291_v32 = vpop.f32.mrf.mxu0  ;;  %v1442_v37 = vpop.f32.mrf.mxu1  ;;  %v1032_v54 = vadd.f32 %v4238_v17, %v881_v48  ;;  %4379 = vmatpush3.msra.mxu0 %v1736_v10  ;;  %4348 = vmatprep.subr.mxu1 %v3696_v16  ;;  %v1182_v25 = vadd.f32 %v5857_v24, %v1031_v5  ;;  %v3748_v24 = vld [vmem:[%s5848_s2 + $0x130] sm:$0xff] }
 0x186   : > { %v1330_v3 = vadd.f32 %v1291_v32, %v1178_v52  ;;  %v1482_v12 = vadd.f32 %v4298_v29, %v1331_v59  ;;  %4380 = vmatprep.subr.mxu0 %v1735_v8  ;;  %4349 = vmatpush3.msra.mxu1 %v3696_v16  ;;  %v5209_v32 = vld [vmem:[%s5848_s2 + $0xe8] sm:$0xff] }
 0x187   : > { %v4279_v2 = vpop.f32.mrf.mxu0  ;;  %v5163_v56 = vpop.f32.mrf.mxu1  ;;  %v1183_v14 = vadd.f32 %v5151_v18, %v1032_v54  ;;  %v5858_v26 = vld [vmem:[#allocation8_spill] sm:$0xff]  ;;  %4381 = vmatpush3.msra.mxu0 %v1735_v8  ;;  %4394 = vmatprep.subr.mxu1 %v5209_v32 }
 0x188   : > { %v1333_v13 = vadd.f32 %v4279_v2, %v1181_v1  ;;  %v1481_v18 = vadd.f32 %v1442_v37, %v1330_v3  ;;  %v1033_v27 = vadd.f32 %v5858_v26, %v882_v6  ;;  %v5859_v2 = vld [vmem:[#allocation7_spill] sm:$0xff]  ;;  %4426 = vmatprep.subr.mxu0 %v5218_v35 }
 0x189   : > { %v1301_v23 = vpop.f32.mrf.mxu0  ;;  %v1452_v55 = vpop.f32.mrf.mxu1  ;;  %v1185_v36 = vadd.f32 %v5859_v2, %v1034_v15  ;;  %v3727_v2 = vld [vmem:[%s5848_s2 + $0xc8] sm:$0xff] }
 0x18a   : > { %v1332_v22 = vadd.f32 %v1301_v23, %v1180_v11  ;;  %v1484_v23 = vadd.f32 %v5163_v56, %v1333_v13  ;;  %v5860_v56 = vld [vmem:[#allocation9_spill] sm:$0xff] }
 0x18b   : > { %v4282_v44 = vpop.f32.mrf.mxu0  ;;  %v4304_v17 = vpop.f32.mrf.mxu1 }
 0x18c   : > { %v1335_v28 = vadd.f32 %v4282_v44, %v1183_v14  ;;  %v1483_v40 = vadd.f32 %v1452_v55, %v1332_v22  ;;  %v1184_v44 = vadd.f32 %v5860_v56, %v1033_v27  ;;  %v3743_v56 = vld [vmem:[%s5848_s2 + $0x108] sm:$0xff] }
 0x18d   : > { %v5166_v58 = vpop.f32.mrf.mxu0  ;;  %v1462_v38 = vpop.f32.mrf.mxu1 }
 0x18e   : > { %v1334_v37 = vadd.f32 %v5166_v58, %v1182_v25  ;;  %v1486_v45 = vadd.f32 %v4304_v17, %v1335_v28  ;;  %v3729_v28 = vld [vmem:[%s5848_s2 + $0xd8] sm:$0xff] }
 0x18f   : > { %v5174_v62 = vpop.f32.mrf.mxu0 }
 0x190   : > { %v1337_v57 = vadd.f32 %v5174_v62, %v1185_v36  ;;  %v1485_v50 = vadd.f32 %v1462_v38, %v1334_v37  ;;  %v3745_v36 = vld [vmem:[%s5848_s2 + $0x118] sm:$0xff] }
 0x191   : > { %v1321_v7 = vpop.f32.mrf.mxu0  ;;  %v4307_v46 = vpop.f32.mrf.mxu1 }
 0x192   : > { %v1336_v52 = vadd.f32 %v1321_v7, %v1184_v44  ;;  %v1488_v55 = vadd.f32 %v4307_v46, %v1337_v57  ;;  %v3724_v46 = vld [vmem:[%s5848_s2 + $0xb0] sm:$0xff]  ;;  %v3723_v57 = vld [vmem:[%s5848_s2 + $0xa8] sm:$0xff] }
 0x193   : > { %v4320_v19 = vpop.f32.mrf.mxu0  ;;  %v1472_v61 = vpop.f32.mrf.mxu1 }
 0x194   : > { %v1633_v21 = vadd.f32 %v4320_v19, %v1482_v12  ;;  %v1487_v3 = vadd.f32 %v1472_v61, %v1336_v52  ;;  %v3785_v52 = vld [vmem:[%s5848_s2 + $0x1d8] sm:$0xff]  ;;  %v3784_v61 = vld [vmem:[%s5848_s2 + $0x1d0] sm:$0xff] }
 0x195   : > { %v1593_v29 = vpop.f32.mrf.mxu0 }
 0x196   : > { %v1648_v33 = vadd.f32 %v5196_v20, %v1633_v21  ;;  %v1632_v34 = vadd.f32 %v1593_v29, %v1481_v18  ;;  %v3730_v21 = vld [vmem:[%s5848_s2 + $0xe0] sm:$0xff]  ;;  %v3747_v29 = vld [vmem:[%s5848_s2 + $0x128] sm:$0xff] }
 0x197   : > { %v4323_v39 = vpop.f32.mrf.mxu0 }
 0x198   : > { %v1656_v41 = vmax.f32 %v1648_v33, 0.0  ;;  %v1647_v42 = vadd.f32 %v5196_v20, %v1632_v34  ;;  %v1635_v43 = vadd.f32 %v4323_v39, %v1484_v23  ;;  %v3728_v23 = vld [vmem:[%s5848_s2 + $0xd0] sm:$0xff]  ;;  %v3746_v33 = vld [vmem:[%s5848_s2 + $0x120] sm:$0xff] }
 0x199   : > { %v1603_v47 = vpop.f32.mrf.mxu0  ;;  %v3726_v39 = vld [vmem:[%s5848_s2 + $0xc0] sm:$0xff] }
 0x19a   : > { %v1655_v48 = vmax.f32 %v1647_v42, 0.0  ;;  %v1650_v49 = vadd.f32 %v5196_v20, %v1635_v43  ;;  %v1634_v58 = vadd.f32 %v1603_v47, %v1483_v40  ;;  %1695 = vrot.lane.b32.xlu1 %v1656_v41, %s4642_s24  ;;  %v3744_v40 = vld [vmem:[%s5848_s2 + $0x110] sm:$0xff]  ;;  %v3725_v43 = vld [vmem:[%s5848_s2 + $0xb8] sm:$0xff]  ;;  %v3742_v47 = vld [vmem:[%s5848_s2 + $0x100] sm:$0xff] }
 0x19b   : > { %v4326_v51 = vpop.f32.mrf.mxu0 }
 0x19c   : > { %v1658_v53 = vmax.f32 %v1650_v49, 0.0  ;;  %v1649_v59 = vadd.f32 %v5196_v20, %v1634_v58  ;;  %v1637_v60 = vadd.f32 %v4326_v51, %v1486_v45  ;;  %1693 = vrot.lane.b32.xlu0 %v1655_v48, %s4642_s24  ;;  %v3741_v48 = vld [vmem:[%s5848_s2 + $0xf8] sm:$0xff]  ;;  %v3722_v49 = vld [vmem:[%s5848_s2 + $0xa0] sm:$0xff]  ;;  %v3740_v58 = vld [vmem:[%s5848_s2 + $0xf0] sm:$0xff] }
 0x19d   : > { %v1613_v54 = vpop.f32.mrf.mxu0  ;;  %v3767_v51 = vld [vmem:[%s5848_s2 + $0x188] sm:$0xff] }
 0x19e   : > { %v1657_v62 = vmax.f32 %v1649_v59, 0.0  ;;  %v1652_v63 = vadd.f32 %v5196_v20, %v1637_v60  ;;  %v1636_v0 = vadd.f32 %v1613_v54, %v1485_v50  ;;  %1699 = vrot.lane.b32.xlu1 %v1658_v53, %s4642_s24  ;;  %v2022_v50 = vld [vmem:[#allocation3 + $0x2] sm:$0xff]  ;;  %v3765_v54 = vld [vmem:[%s5848_s2 + $0x178] sm:$0xff] }
 0x19f   : > { %v4329_v1 = vpop.f32.mrf.mxu0  ;;  %v3766_v60 = vld [vmem:[%s5848_s2 + $0x180] sm:$0xff] }
 0x1a0   : > { %v1660_v4 = vmax.f32 %v1652_v63, 0.0  ;;  %v1651_v5 = vadd.f32 %v5196_v20, %v1636_v0  ;;  %v1639_v7 = vadd.f32 %v4329_v1, %v1488_v55  ;;  %1697 = vrot.lane.b32.xlu0 %v1657_v62, %s4642_s24  ;;  %v3783_v55 = vld [vmem:[%s5848_s2 + $0x1c8] sm:$0xff]  ;;  %v3764_v0 = vld [vmem:[%s5848_s2 + $0x170] sm:$0xff]  ;;  %v3782_v1 = vld [vmem:[%s5848_s2 + $0x1c0] sm:$0xff] }
 0x1a1   : > { %v1623_v9 = vpop.f32.mrf.mxu0 }
 0x1a2   : > { %v1659_v10 = vmax.f32 %v1651_v5, 0.0  ;;  %v1654_v11 = vadd.f32 %v5196_v20, %v1639_v7  ;;  %v1638_v12 = vadd.f32 %v1623_v9, %v1487_v3  ;;  %1703 = vrot.lane.b32.xlu1 %v1660_v4, %s4642_s24  ;;  %v3763_v3 = vld [vmem:[%s5848_s2 + $0x168] sm:$0xff]  ;;  %v3781_v4 = vld [vmem:[%s5848_s2 + $0x1b8] sm:$0xff]  ;;  %v3762_v9 = vld [vmem:[%s5848_s2 + $0x160] sm:$0xff] }
 0x1a4   : > { %v1662_v13 = vmax.f32 %v1654_v11, 0.0  ;;  %v1653_v6 = vadd.f32 %v5196_v20, %v1638_v12  ;;  %1701 = vrot.lane.b32.xlu0 %v1659_v10, %s4642_s24  ;;  %v3780_v10 = vld [vmem:[%s5848_s2 + $0x1b0] sm:$0xff]  ;;  %v3761_v11 = vld [vmem:[%s5848_s2 + $0x158] sm:$0xff]  ;;  %v3779_v12 = vld [vmem:[%s5848_s2 + $0x1a8] sm:$0xff] }
 0x1a6   : > { %v1661_v14 = vmax.f32 %v1653_v6, 0.0  ;;  %1707 = vrot.lane.b32.xlu1 %v1662_v13, %s4642_s24 }
 0x1a8   : > { %1705 = vrot.lane.b32.xlu0 %v1661_v14, %s4642_s24  ;;  %v3760_v14 = vld [vmem:[%s5848_s2 + $0x150] sm:$0xff] }
 0x20c   : > { %v1696_v15 = vpop.permute.xlu1 %1695 }
 0x20d   : > { %1720 = vst.msk [vmem:[#allocation3 + $0x21] sm:$0xff] %vm1718_vm5, %v1696_v15  ;;  %v3778_v15 = vld [vmem:[%s5848_s2 + $0x1a0] sm:$0xff] }
 0x20e   : > { %v1694_v17 = vpop.permute.xlu0 %1693 }
 0x20f   : > { %1719 = vst.msk [vmem:[#allocation3 + $0x11] sm:$0xff] %vm1718_vm5, %v1694_v17  ;;  %v3759_v17 = vld [vmem:[%s5848_s2 + $0x148] sm:$0xff] }
 0x210   : > { %v1700_v19 = vpop.permute.xlu1 %1699 }
 0x211   : > { %1722 = vst.msk [vmem:[#allocation3 + $0x41] sm:$0xff] %vm1718_vm5, %v1700_v19  ;;  %v3777_v19 = vld [vmem:[%s5848_s2 + $0x198] sm:$0xff] }
 0x212   : > { %v1698_v16 = vpop.permute.xlu0 %1697 }
 0x213   : > { %1721 = vst.msk [vmem:[#allocation3 + $0x31] sm:$0xff] %vm1718_vm5, %v1698_v16  ;;  %v3758_v16 = vld [vmem:[%s5848_s2 + $0x140] sm:$0xff] }
 0x214   : > { %v1704_v20 = vpop.permute.xlu1 %1703  ;;  %v5263_v25 = vld [vmem:[#allocation3 + $0x21] sm:$0xff] }
 0x215   : > { %1724 = vst.msk [vmem:[#allocation3 + $0x61] sm:$0xff] %vm1718_vm5, %v1704_v20  ;;  %v5265_v26 = vld [vmem:[#allocation3 + $0x20] sm:$0xff]  ;;  %v3776_v20 = vld [vmem:[%s5848_s2 + $0x190] sm:$0xff] }
 0x216   : > { %v1702_v8 = vpop.permute.xlu0 %1701  ;;  %v5246_v18 = vld [vmem:[#allocation3 + $0x11] sm:$0xff]  ;;  %v5376_v59 = vld [vmem:[#allocation3 + $0x22] sm:$0xff] }
 0x217   : > { %v5248_v22 = vld [vmem:[#allocation3 + $0x10] sm:$0xff]  ;;  %1723 = vst.msk [vmem:[#allocation3 + $0x51] sm:$0xff] %vm1718_vm5, %v1702_v8  ;;  %4351 = vmatmul.mubr.msk.f32.vlgmr.msra.gmra.mxu1 %vm1663_vm3, %v5246_v18  ;;  %v3803_v8 = vld [vmem:[%s5848_s2 + $0x228] sm:$0xff] }
 0x218   : > { %4383 = vmatmul.mubr.msk.f32.vlgmr.msra.gmra.mxu0 %vm1663_vm3, %v5248_v22  ;;  %4395 = vmatpush3.msra.mxu1 %v5209_v32  ;;  %v1708_v27 = vpop.permute.xlu1 %1707  ;;  %v5293_v34 = vld [vmem:[#allocation3 + $0x41] sm:$0xff]  ;;  %v5370_v53 = vld [vmem:[#allocation3 + $0x12] sm:$0xff] }
 0x219   : > { %4427 = vmatpush3.msra.mxu0 %v5218_v35  ;;  %4353 = vmatprep.mubr.msk.f32.mxu1 %vm1663_vm3, %v5263_v25  ;;  %1726 = vst.msk [vmem:[#allocation3 + $0x81] sm:$0xff] %vm1718_vm5, %v1708_v27  ;;  %v5295_v35 = vld [vmem:[#allocation3 + $0x40] sm:$0xff]  ;;  %v3819_v27 = vld [vmem:[%s5848_s2 + $0x268] sm:$0xff] }
 0x21a   : > { %4385 = vmatprep.mubr.msk.f32.mxu0 %vm1663_vm3, %v5265_v26  ;;  %4396 = vmatprep.subr.mxu1 %v3730_v21  ;;  %v1706_v30 = vpop.permute.xlu0 %1705  ;;  %v5278_v31 = vld [vmem:[#allocation3 + $0x31] sm:$0xff]  ;;  %v5400_v63 = vld [vmem:[#allocation3 + $0x42] sm:$0xff] }
 0x21b   : > { %4428 = vmatprep.subr.mxu0 %v3748_v24  ;;  %v5280_v32 = vld [vmem:[#allocation3 + $0x30] sm:$0xff]  ;;  %4397 = vmatpush3.msra.mxu1 %v3730_v21  ;;  %1725 = vst.msk [vmem:[#allocation3 + $0x71] sm:$0xff] %vm1718_vm5, %v1706_v30  ;;  %v3799_v30 = vld [vmem:[%s5848_s2 + $0x208] sm:$0xff] }
 0x21c   : > { %4429 = vmatpush3.msra.mxu0 %v3748_v24  ;;  %4398 = vmatprep.subr.mxu1 %v3729_v28  ;;  %v5321_v41 = vld [vmem:[#allocation3 + $0x61] sm:$0xff]  ;;  %v5394_v62 = vld [vmem:[#allocation3 + $0x32] sm:$0xff] }
 0x21d   : > { %4430 = vmatprep.subr.mxu0 %v3747_v29  ;;  %4354 = vmatmul.mubr.msk.f32.gmra.mxu1 %vm1663_vm3, %v5278_v31  ;;  %v5323_v42 = vld [vmem:[#allocation3 + $0x60] sm:$0xff]  ;;  %v3820_v21 = vld [vmem:[%s5848_s2 + $0x270] sm:$0xff]  ;;  %v3801_v24 = vld [vmem:[%s5848_s2 + $0x218] sm:$0xff] }
 0x21e   : > { %4386 = vmatmul.mubr.msk.f32.gmra.mxu0 %vm1663_vm3, %v5280_v32  ;;  %4399 = vmatpush3.msra.mxu1 %v3729_v28  ;;  %v5307_v37 = vld [vmem:[#allocation3 + $0x51] sm:$0xff]  ;;  %v5424_v7 = vld [vmem:[#allocation3 + $0x62] sm:$0xff] }
 0x21f   : > { %4431 = vmatpush3.msra.mxu0 %v3747_v29  ;;  %4356 = vmatprep.mubr.msk.f32.mxu1 %vm1663_vm3, %v5293_v34  ;;  %v5309_v38 = vld [vmem:[#allocation3 + $0x50] sm:$0xff]  ;;  %v3818_v29 = vld [vmem:[%s5848_s2 + $0x260] sm:$0xff] }
 0x220   : > { %4388 = vmatprep.mubr.msk.f32.mxu0 %vm1663_vm3, %v5295_v35  ;;  %4400 = vmatprep.subr.mxu1 %v3728_v23  ;;  %v5418_v5 = vld [vmem:[#allocation3 + $0x52] sm:$0xff]  ;;  %v5444_v6 = vld [vmem:[#allocation3 + $0x80] sm:$0xff] }
 0x221   : > { %4432 = vmatprep.subr.mxu0 %v3746_v33  ;;  %4401 = vmatpush3.msra.mxu1 %v3728_v23  ;;  %v3800_v28 = vld [vmem:[%s5848_s2 + $0x210] sm:$0xff]  ;;  %v3817_v23 = vld [vmem:[%s5848_s2 + $0x258] sm:$0xff] }
 0x222   : > { %4433 = vmatpush3.msra.mxu0 %v3746_v33  ;;  %4402 = vmatprep.subr.mxu1 %v3727_v2  ;;  %v5335_v44 = vld [vmem:[#allocation3 + $0x71] sm:$0xff]  ;;  %v3798_v33 = vld [vmem:[%s5848_s2 + $0x200] sm:$0xff] }
 0x223   : > { %4434 = vmatprep.subr.mxu0 %v3745_v36  ;;  %4357 = vmatmul.mubr.msk.f32.gmra.mxu1 %vm1663_vm3, %v5307_v37  ;;  %v5337_v45 = vld [vmem:[#allocation3 + $0x70] sm:$0xff] }
 0x224   : > { %4389 = vmatmul.mubr.msk.f32.gmra.mxu0 %vm1663_vm3, %v5309_v38  ;;  %4403 = vmatpush3.msra.mxu1 %v3727_v2  ;;  %v5442_v13 = vld [vmem:[#allocation3 + $0x72] sm:$0xff] }
 0x225   : > { %4435 = vmatpush3.msra.mxu0 %v3745_v36  ;;  %4359 = vmatprep.mubr.msk.f32.mxu1 %vm1663_vm3, %v5321_v41  ;;  %v3816_v2 = vld [vmem:[%s5848_s2 + $0x250] sm:$0xff]  ;;  %v3797_v36 = vld [vmem:[%s5848_s2 + $0x1f8] sm:$0xff] }
 0x226   : > { %4391 = vmatprep.mubr.msk.f32.mxu0 %vm1663_vm3, %v5323_v42  ;;  %4404 = vmatprep.subr.mxu1 %v3726_v39 }
 0x227   : > { %4436 = vmatprep.subr.mxu0 %v3744_v40  ;;  %4405 = vmatpush3.msra.mxu1 %v3726_v39  ;;  %v3815_v39 = vld [vmem:[%s5848_s2 + $0x248] sm:$0xff] }
 0x228   : > { %4437 = vmatpush3.msra.mxu0 %v3744_v40  ;;  %4406 = vmatprep.subr.mxu1 %v3725_v43  ;;  %v2341_v40 = vld [vmem:[#allocation3 + $0x81] sm:$0xff] }
 0x229   : > { %4438 = vmatprep.subr.mxu0 %v3743_v56  ;;  %4360 = vmatmul.mubr.msk.f32.gmra.mxu1 %vm1663_vm3, %v5335_v44 }
 0x22a   : > { %4392 = vmatmul.mubr.msk.f32.gmra.mxu0 %vm1663_vm3, %v5337_v45  ;;  %4407 = vmatpush3.msra.mxu1 %v3725_v43  ;;  %v5538_v43 = vld [vmem:[#allocation3 + $0x82] sm:$0xff] }
 0x22b   : > { %4439 = vmatpush3.msra.mxu0 %v3743_v56  ;;  %4408 = vmatprep.subr.mxu1 %v3724_v46  ;;  %v3796_v56 = vld [vmem:[%s5848_s2 + $0x1f0] sm:$0xff] }
 0x22c   : > { %4440 = vmatprep.subr.mxu0 %v3742_v47  ;;  %4446 = vmatprep.mubr.msk.f32.mxu0 %vm1663_vm3, %v5248_v22  ;;  %v3802_v22 = vld [vmem:[%s5848_s2 + $0x220] sm:$0xff] }
 0x22d   : > { %4409 = vmatpush3.msra.mxu1 %v3724_v46  ;;  %4441 = vmatpush3.msra.mxu0 %v3742_v47  ;;  %v3814_v46 = vld [vmem:[%s5848_s2 + $0x240] sm:$0xff]  ;;  %v3795_v47 = vld [vmem:[%s5848_s2 + $0x1e8] sm:$0xff] }
 0x22e   : > { %4410 = vmatprep.subr.mxu1 %v3723_v57  ;;  %4442 = vmatprep.subr.mxu0 %v3741_v48 }
 0x22f   : > { %4411 = vmatpush3.msra.mxu1 %v3723_v57  ;;  %4443 = vmatpush3.msra.mxu0 %v3741_v48  ;;  %v3813_v57 = vld [vmem:[%s5848_s2 + $0x238] sm:$0xff]  ;;  %v3839_v48 = vld [vmem:[%s5848_s2 + $0x2c8] sm:$0xff] }
 0x230   : > { %4412 = vmatprep.subr.mxu1 %v3722_v49  ;;  %4444 = vmatprep.subr.mxu0 %v3740_v58 }
 0x231   : > { %4413 = vmatpush3.msra.mxu1 %v3722_v49  ;;  %4414 = vmatprep.mubr.msk.f32.mxu1 %vm1663_vm3, %v2022_v50  ;;  %v3838_v49 = vld [vmem:[%s5848_s2 + $0x2c0] sm:$0xff] }
 0x232   : > { %4445 = vmatpush3.msra.mxu0 %v3740_v58  ;;  %4415 = vmatmul.mubr.msk.f32.vlgmr.msra.gmra.mxu1 %vm1663_vm3, %v5370_v53  ;;  %v3837_v58 = vld [vmem:[%s5848_s2 + $0x2b8] sm:$0xff] }
 0x233   : > { %4447 = vmatmul.mubr.msk.f32.vlgmr.msra.gmra.mxu0 %vm1663_vm3, %v5265_v26  ;;  %4458 = vmatprep.subr.mxu1 %v3767_v51 }
 0x234   : > { %4490 = vmatprep.subr.mxu0 %v3785_v52  ;;  %4417 = vmatprep.mubr.msk.f32.mxu1 %vm1663_vm3, %v5376_v59 }
 0x235   : > { %4449 = vmatprep.mubr.msk.f32.mxu0 %vm1663_vm3, %v5280_v32  ;;  %4459 = vmatpush3.msra.mxu1 %v3767_v51 }
 0x236   : > { %4491 = vmatpush3.msra.mxu0 %v3785_v52  ;;  %4460 = vmatprep.subr.mxu1 %v3766_v60 }
 0x237   : > { %4492 = vmatprep.subr.mxu0 %v3784_v61  ;;  %4461 = vmatpush3.msra.mxu1 %v3766_v60 }
 0x238   : > { %4493 = vmatpush3.msra.mxu0 %v3784_v61  ;;  %4418 = vmatmul.mubr.msk.f32.gmra.mxu1 %vm1663_vm3, %v5394_v62 }
 0x239   : > { %4450 = vmatmul.mubr.msk.f32.gmra.mxu0 %vm1663_vm3, %v5295_v35  ;;  %4462 = vmatprep.subr.mxu1 %v3765_v54 }
 0x23a   : > { %4494 = vmatprep.subr.mxu0 %v3783_v55  ;;  %4420 = vmatprep.mubr.msk.f32.mxu1 %vm1663_vm3, %v5400_v63 }
 0x23b   : > { %4452 = vmatprep.mubr.msk.f32.mxu0 %vm1663_vm3, %v5309_v38  ;;  %4463 = vmatpush3.msra.mxu1 %v3765_v54 }
 0x23c   : > { %4495 = vmatpush3.msra.mxu0 %v3783_v55  ;;  %4464 = vmatprep.subr.mxu1 %v3764_v0 }
 0x23d   : > { %4496 = vmatprep.subr.mxu0 %v3782_v1  ;;  %4465 = vmatpush3.msra.mxu1 %v3764_v0 }
 0x23e   : > { %4497 = vmatpush3.msra.mxu0 %v3782_v1  ;;  %4421 = vmatmul.mubr.msk.f32.gmra.mxu1 %vm1663_vm3, %v5418_v5 }
 0x23f   : > { %4453 = vmatmul.mubr.msk.f32.gmra.mxu0 %vm1663_vm3, %v5323_v42  ;;  %4466 = vmatprep.subr.mxu1 %v3763_v3 }
 0x240   : > { %4498 = vmatprep.subr.mxu0 %v3781_v4  ;;  %4423 = vmatprep.mubr.msk.f32.mxu1 %vm1663_vm3, %v5424_v7 }
 0x241   : > { %4455 = vmatprep.mubr.msk.f32.mxu0 %vm1663_vm3, %v5337_v45  ;;  %4467 = vmatpush3.msra.mxu1 %v3763_v3 }
 0x242   : > { %4499 = vmatpush3.msra.mxu0 %v3781_v4  ;;  %4468 = vmatprep.subr.mxu1 %v3762_v9 }
 0x243   : > { %4500 = vmatprep.subr.mxu0 %v3780_v10  ;;  %4469 = vmatpush3.msra.mxu1 %v3762_v9 }
 0x244   : > { %4501 = vmatpush3.msra.mxu0 %v3780_v10  ;;  %4424 = vmatmul.mubr.msk.f32.gmra.mxu1 %vm1663_vm3, %v5442_v13 }
 0x245   : > { %4456 = vmatmul.mubr.msk.f32.gmra.mxu0 %vm1663_vm3, %v5444_v6  ;;  %4470 = vmatprep.subr.mxu1 %v3761_v11 }
 0x246   : > { %4502 = vmatprep.subr.mxu0 %v3779_v12  ;;  %4471 = vmatpush3.msra.mxu1 %v3761_v11 }
 0x247   : > { %4478 = vmatprep.mubr.msk.f32.mxu1 %vm1663_vm3, %v5246_v18  ;;  %4503 = vmatpush3.msra.mxu0 %v3779_v12  ;;  %v3821_v18 = vld [vmem:[%s5848_s2 + $0x278] sm:$0xff] }
 0x248   : > { %4510 = vmatprep.mubr.msk.f32.mxu0 %vm1663_vm3, %v5370_v53  ;;  %4472 = vmatprep.subr.mxu1 %v3760_v14 }
 0x249   : > { %4504 = vmatprep.subr.mxu0 %v3778_v15  ;;  %4473 = vmatpush3.msra.mxu1 %v3760_v14 }
 0x24a   : > { %4505 = vmatpush3.msra.mxu0 %v3778_v15  ;;  %4474 = vmatprep.subr.mxu1 %v3759_v17 }
 0x24b   : > { %4506 = vmatprep.subr.mxu0 %v3777_v19  ;;  %4475 = vmatpush3.msra.mxu1 %v3759_v17 }
 0x24c   : > { %4507 = vmatpush3.msra.mxu0 %v3777_v19  ;;  %4476 = vmatprep.subr.mxu1 %v3758_v16 }
 0x24d   : > { %4508 = vmatprep.subr.mxu0 %v3776_v20  ;;  %4477 = vmatpush3.msra.mxu1 %v3758_v16 }
 0x24e   : > { %4509 = vmatpush3.msra.mxu0 %v3776_v20  ;;  %4479 = vmatmul.mubr.msk.f32.vlgmr.msra.gmra.mxu1 %vm1663_vm3, %v5263_v25 }
 0x24f   : > { %4511 = vmatmul.mubr.msk.f32.vlgmr.msra.gmra.mxu0 %vm1663_vm3, %v5376_v59  ;;  %4522 = vmatprep.subr.mxu1 %v3803_v8 }
 0x250   : > { %4554 = vmatprep.subr.mxu0 %v3821_v18  ;;  %4481 = vmatprep.mubr.msk.f32.mxu1 %vm1663_vm3, %v5278_v31 }
 0x251   : > { %4513 = vmatprep.mubr.msk.f32.mxu0 %vm1663_vm3, %v5394_v62  ;;  %4523 = vmatpush3.msra.mxu1 %v3803_v8 }
 0x252   : > { %4555 = vmatpush3.msra.mxu0 %v3821_v18  ;;  %4524 = vmatprep.subr.mxu1 %v3802_v22 }
 0x253   : > { %4556 = vmatprep.subr.mxu0 %v3820_v21  ;;  %4525 = vmatpush3.msra.mxu1 %v3802_v22 }
 0x254   : > { %4557 = vmatpush3.msra.mxu0 %v3820_v21  ;;  %4482 = vmatmul.mubr.msk.f32.gmra.mxu1 %vm1663_vm3, %v5293_v34 }
 0x255   : > { %4514 = vmatmul.mubr.msk.f32.gmra.mxu0 %vm1663_vm3, %v5400_v63  ;;  %4526 = vmatprep.subr.mxu1 %v3801_v24 }
 0x256   : > { %4558 = vmatprep.subr.mxu0 %v3819_v27  ;;  %4484 = vmatprep.mubr.msk.f32.mxu1 %vm1663_vm3, %v5307_v37 }
 0x257   : > { %4516 = vmatprep.mubr.msk.f32.mxu0 %vm1663_vm3, %v5418_v5  ;;  %4527 = vmatpush3.msra.mxu1 %v3801_v24 }
 0x258   : > { %4559 = vmatpush3.msra.mxu0 %v3819_v27  ;;  %4528 = vmatprep.subr.mxu1 %v3800_v28 }
 0x259   : > { %4560 = vmatprep.subr.mxu0 %v3818_v29  ;;  %4529 = vmatpush3.msra.mxu1 %v3800_v28 }
 0x25a   : > { %4561 = vmatpush3.msra.mxu0 %v3818_v29  ;;  %4485 = vmatmul.mubr.msk.f32.gmra.mxu1 %vm1663_vm3, %v5321_v41 }
 0x25b   : > { %4517 = vmatmul.mubr.msk.f32.gmra.mxu0 %vm1663_vm3, %v5424_v7  ;;  %4530 = vmatprep.subr.mxu1 %v3799_v30 }
 0x25c   : > { %4562 = vmatprep.subr.mxu0 %v3817_v23  ;;  %4487 = vmatprep.mubr.msk.f32.mxu1 %vm1663_vm3, %v5335_v44 }
 0x25d   : > { %4519 = vmatprep.mubr.msk.f32.mxu0 %vm1663_vm3, %v5442_v13  ;;  %4531 = vmatpush3.msra.mxu1 %v3799_v30 }
 0x25e   : > { %4563 = vmatpush3.msra.mxu0 %v3817_v23  ;;  %4532 = vmatprep.subr.mxu1 %v3798_v33 }
 0x25f   : > { %4564 = vmatprep.subr.mxu0 %v3816_v2  ;;  %4533 = vmatpush3.msra.mxu1 %v3798_v33 }
 0x260   : > { %4565 = vmatpush3.msra.mxu0 %v3816_v2  ;;  %4488 = vmatmul.mubr.msk.f32.gmra.mxu1 %vm1663_vm3, %v2341_v40 }
 0x261   : > { %4520 = vmatmul.mubr.msk.f32.gmra.mxu0 %vm1663_vm3, %v5538_v43  ;;  %4534 = vmatprep.subr.mxu1 %v3797_v36 }
 0x262   : > { %4566 = vmatprep.subr.mxu0 %v3815_v39  ;;  %4535 = vmatpush3.msra.mxu1 %v3797_v36 }
 0x263   : > { %4542 = vmatprep.mubr.msk.f32.mxu1 %vm1663_vm3, %v5265_v26  ;;  %4567 = vmatpush3.msra.mxu0 %v3815_v39  ;;  %v3794_v26 = vld [vmem:[%s5848_s2 + $0x1e0] sm:$0xff] }
 0x264   : > { %4574 = vmatprep.mubr.msk.f32.mxu0 %vm1663_vm3, %v5263_v25  ;;  %4536 = vmatprep.subr.mxu1 %v3796_v56  ;;  %v3812_v25 = vld [vmem:[%s5848_s2 + $0x230] sm:$0xff] }
 0x265   : > { %4568 = vmatprep.subr.mxu0 %v3814_v46  ;;  %4537 = vmatpush3.msra.mxu1 %v3796_v56 }
 0x266   : > { %4569 = vmatpush3.msra.mxu0 %v3814_v46  ;;  %4538 = vmatprep.subr.mxu1 %v3795_v47 }
 0x267   : > { %4570 = vmatprep.subr.mxu0 %v3813_v57  ;;  %4539 = vmatpush3.msra.mxu1 %v3795_v47 }
 0x268   : > { %4571 = vmatpush3.msra.mxu0 %v3813_v57  ;;  %4540 = vmatprep.subr.mxu1 %v3794_v26 }
 0x269   : > { %4572 = vmatprep.subr.mxu0 %v3812_v25  ;;  %4541 = vmatpush3.msra.mxu1 %v3794_v26 }
 0x26a   : > { %4573 = vmatpush3.msra.mxu0 %v3812_v25  ;;  %4543 = vmatmul.mubr.msk.f32.vlgmr.msra.gmra.mxu1 %vm1663_vm3, %v5280_v32  ;;  %v3835_v32 = vld [vmem:[%s5848_s2 + $0x2a8] sm:$0xff] }
 0x26b   : > { %4575 = vmatmul.mubr.msk.f32.vlgmr.msra.gmra.mxu0 %vm1663_vm3, %v5278_v31  ;;  %4586 = vmatprep.subr.mxu1 %v3839_v48  ;;  %v3836_v31 = vld [vmem:[%s5848_s2 + $0x2b0] sm:$0xff] }
 0x26c   : > { %4545 = vmatprep.mubr.msk.f32.mxu1 %vm1663_vm3, %v5295_v35  ;;  %4577 = vmatprep.mubr.msk.f32.mxu0 %vm1663_vm3, %v5293_v34  ;;  %v3834_v34 = vld [vmem:[%s5848_s2 + $0x2a0] sm:$0xff]  ;;  %v2810_v35 = vld [vmem:[#allocation3 + $0x91] sm:$0xff] }
 0x26d   : > { %4587 = vmatpush3.msra.mxu1 %v3839_v48 }
 0x26e   : > { %4588 = vmatprep.subr.mxu1 %v3838_v49  ;;  %4546 = vmatmul.mubr.msk.f32.gmra.mxu1 %vm1663_vm3, %v5309_v38  ;;  %v3833_v38 = vld [vmem:[%s5848_s2 + $0x298] sm:$0xff] }
 0x26f   : > { %4589 = vmatpush3.msra.mxu1 %v3838_v49  ;;  %4578 = vmatmul.mubr.msk.f32.gmra.mxu0 %vm1663_vm3, %v5307_v37  ;;  %v2654_v37 = vld [vmem:[#allocation3 + $0x90] sm:$0xff] }
 0x270   : > { %4590 = vmatprep.subr.mxu1 %v3837_v58  ;;  %4548 = vmatprep.mubr.msk.f32.mxu1 %vm1663_vm3, %v5323_v42  ;;  %v3831_v42 = vld [vmem:[%s5848_s2 + $0x288] sm:$0xff] }
 0x271   : > { %4580 = vmatprep.mubr.msk.f32.mxu0 %vm1663_vm3, %v5321_v41  ;;  %4591 = vmatpush3.msra.mxu1 %v3837_v58  ;;  %v3832_v41 = vld [vmem:[%s5848_s2 + $0x290] sm:$0xff] }
 0x272   : > { %4592 = vmatprep.subr.mxu1 %v3836_v31  ;;  %4549 = vmatmul.mubr.msk.f32.gmra.mxu1 %vm1663_vm3, %v5337_v45  ;;  %v2966_v45 = vld [vmem:[#allocation3 + $0x92] sm:$0xff] }
 0x273   : > { %4581 = vmatmul.mubr.msk.f32.gmra.mxu0 %vm1663_vm3, %v5335_v44  ;;  %4593 = vmatpush3.msra.mxu1 %v3836_v31  ;;  %v3830_v44 = vld [vmem:[%s5848_s2 + $0x280] sm:$0xff] }
 0x274   : > { %4583 = vmatprep.mubr.msk.f32.mxu0 %vm1663_vm3, %v2341_v40  ;;  %4594 = vmatprep.subr.mxu1 %v3835_v32 }
 0x275   : > { %4551 = vmatprep.mubr.msk.f32.mxu1 %vm1663_vm3, %v5444_v6  ;;  %4595 = vmatpush3.msra.mxu1 %v3835_v32 }
 0x276   : > { %4596 = vmatprep.subr.mxu1 %v3834_v34  ;;  %4552 = vmatmul.mubr.msk.f32.gmra.mxu1 %vm1663_vm3, %v2654_v37 }
 0x277   : > { %4584 = vmatmul.mubr.msk.f32.gmra.mxu0 %vm1663_vm3, %v2810_v35  ;;  %4597 = vmatpush3.msra.mxu1 %v3834_v34 }
 0x278   : > { %4598 = vmatprep.subr.mxu1 %v3833_v38  ;;  %4606 = vmatprep.mubr.msk.f32.mxu1 %vm1663_vm3, %v5376_v59 }
 0x279   : > { %4599 = vmatpush3.msra.mxu1 %v3833_v38 }
 0x27a   : > { %4600 = vmatprep.subr.mxu1 %v3832_v41 }
 0x27b   : > { %4601 = vmatpush3.msra.mxu1 %v3832_v41 }
 0x27c   : > { %4602 = vmatprep.subr.mxu1 %v3831_v42 }
 0x27d   : > { %4603 = vmatpush3.msra.mxu1 %v3831_v42 }
 0x27e   : > { %4604 = vmatprep.subr.mxu1 %v3830_v44 }
 0x27f   : > { %4605 = vmatpush3.msra.mxu1 %v3830_v44 }
 0x280   : > { %4607 = vmatmul.mubr.msk.f32.vlgmr.msra.gmra.mxu1 %vm1663_vm3, %v5394_v62 }
 0x281   : > { %4609 = vmatprep.mubr.msk.f32.mxu1 %vm1663_vm3, %v5400_v63 }
 0x284   : > { %4610 = vmatmul.mubr.msk.f32.gmra.mxu1 %vm1663_vm3, %v5418_v5 }
 0x285   : > { %4612 = vmatprep.mubr.msk.f32.mxu1 %vm1663_vm3, %v5424_v7 }
 0x288   : > { %4613 = vmatmul.mubr.msk.f32.gmra.mxu1 %vm1663_vm3, %v5442_v13 }
 0x289   : > { %4615 = vmatprep.mubr.msk.f32.mxu1 %vm1663_vm3, %v5538_v43 }
 0x28c   : > { %4616 = vmatmul.mubr.msk.f32.gmra.mxu1 %vm1663_vm3, %v2966_v45 }
 0x2d7   : > { %v4352_v50 = vpop.f32.mrf.mxu1 }
 0x2d8   : > { %v4384_v51 = vpop.f32.mrf.mxu0 }
 0x2d9   : > { %v1854_v52 = vpop.f32.mrf.mxu1  ;;  %v1989_v26 = vadd.f32 %v4384_v51, %v4352_v50 }
 0x2da   : > { %v1983_v53 = vpop.f32.mrf.mxu0 }
 0x2db   : > { %v1984_v48 = vadd.f32 %v1983_v53, %v1854_v52 }
 0x2dd   : > { %v4355_v59 = vpop.f32.mrf.mxu1 }
 0x2de   : > { %v4387_v60 = vpop.f32.mrf.mxu0 }
 0x2df   : > { %v1864_v61 = vpop.f32.mrf.mxu1  ;;  %v1999_v32 = vadd.f32 %v4387_v60, %v4355_v59 }
 0x2e0   : > { %v1993_v54 = vpop.f32.mrf.mxu0 }
 0x2e1   : > { %v1994_v37 = vadd.f32 %v1993_v54, %v1864_v61 }
 0x2e3   : > { %v4358_v55 = vpop.f32.mrf.mxu1 }
 0x2e4   : > { %v4390_v62 = vpop.f32.mrf.mxu0 }
 0x2e5   : > { %v1874_v63 = vpop.f32.mrf.mxu1  ;;  %v2009_v42 = vadd.f32 %v4390_v62, %v4358_v55 }
 0x2e6   : > { %v2003_v0 = vpop.f32.mrf.mxu0 }
 0x2e9   : > { %v4361_v1 = vpop.f32.mrf.mxu1 }
 0x2ea   : > { %v4393_v3 = vpop.f32.mrf.mxu0 }
 0x2eb   : > { %v5635_v4 = vpop.f32.mrf.mxu1  ;;  %v2019_v53 = vadd.f32 %v4393_v3, %v4361_v1 }
 0x2ec   : > { %5861 = vst [vmem:[#allocation6_spill] sm:$0xff] %v5635_v4  ;;  %v5637_v5 = vpop.f32.mrf.mxu0  ;;  %v2004_v4 = vadd.f32 %v2003_v0, %v1874_v63 }
 0x2ed   : > { %5862 = vst [vmem:[#allocation8_spill] sm:$0xff] %v5637_v5 }
 0x2f2   : > { %v4416_v7 = vpop.f32.mrf.mxu1 }
 0x2f3   : > { %v4448_v9 = vpop.f32.mrf.mxu0  ;;  %v2171_v49 = vadd.f32 %v4416_v7, %v1989_v26  ;;  %v5866_v61 = vld [vmem:[#allocation6_spill] sm:$0xff] }
 0x2f4   : > { %v2131_v10 = vpop.f32.mrf.mxu1  ;;  %v5867_v54 = vld [vmem:[#allocation8_spill] sm:$0xff] }
 0x2f5   : > { %v2287_v11 = vpop.f32.mrf.mxu0  ;;  %v2170_v34 = vadd.f32 %v2131_v10, %v1984_v48  ;;  %v2327_v38 = vadd.f32 %v4448_v9, %v2171_v49  ;;  %v2014_v9 = vadd.f32 %v5867_v54, %v5866_v61 }
 0x2f8   : > { %v4419_v12 = vpop.f32.mrf.mxu1 }
 0x2f9   : > { %v4451_v13 = vpop.f32.mrf.mxu0  ;;  %v2173_v41 = vadd.f32 %v4419_v12, %v1999_v32 }
 0x2fa   : > { %v2141_v6 = vpop.f32.mrf.mxu1 }
 0x2fb   : > { %v2297_v14 = vpop.f32.mrf.mxu0 }
 0x2fe   : > { %v4422_v15 = vpop.f32.mrf.mxu1 }
 0x2ff   : > { %v4454_v17 = vpop.f32.mrf.mxu0  ;;  %v2175_v50 = vadd.f32 %v4422_v15, %v2009_v42 }
 0x300   : > { %v2151_v19 = vpop.f32.mrf.mxu1 }
 0x301   : > { %v2307_v16 = vpop.f32.mrf.mxu0  ;;  %v2174_v7 = vadd.f32 %v2151_v19, %v2004_v4  ;;  %v2331_v55 = vadd.f32 %v4454_v17, %v2175_v50 }
 0x303   : > { %v2330_v63 = vadd.f32 %v2307_v16, %v2174_v7  ;;  %v3848_v16 = vld [vmem:[%s5850_s4] ss:$0 sm:$0xff] }
 0x304   : > { %v4425_v20 = vpop.f32.mrf.mxu1 }
 0x305   : > { %v4457_v8 = vpop.f32.mrf.mxu0  ;;  %v2177_v62 = vadd.f32 %v4425_v20, %v2019_v53 }
 0x306   : > { %v2161_v18 = vpop.f32.mrf.mxu1 }
 0x307   : > { %v5639_v21 = vpop.f32.mrf.mxu0  ;;  %v2176_v0 = vadd.f32 %v2161_v18, %v2014_v9  ;;  %v2333_v3 = vadd.f32 %v4457_v8, %v2177_v62 }
 0x308   : > { %5863 = vst [vmem:[#allocation7_spill] sm:$0xff] %v5639_v21  ;;  %v2326_v21 = vadd.f32 %v2287_v11, %v2170_v34 }
 0x30e   : > { %v4480_v22 = vpop.f32.mrf.mxu1 }
 0x30f   : > { %v4512_v27 = vpop.f32.mrf.mxu0  ;;  %v2483_v5 = vadd.f32 %v4480_v22, %v2327_v38 }
 0x310   : > { %v2443_v24 = vpop.f32.mrf.mxu1 }
 0x311   : > { %v2599_v29 = vpop.f32.mrf.mxu0  ;;  %v2482_v52 = vadd.f32 %v2443_v24, %v2326_v21  ;;  %v2639_v60 = vadd.f32 %v4512_v27, %v2483_v5  ;;  %v5868_v27 = vld [vmem:[#allocation7_spill] sm:$0xff] }
 0x313   : > { %v2638_v11 = vadd.f32 %v2599_v29, %v2482_v52 }
 0x314   : > { %v4483_v28 = vpop.f32.mrf.mxu1 }
 0x315   : > { %v4515_v23 = vpop.f32.mrf.mxu0 }
 0x316   : > { %v2453_v30 = vpop.f32.mrf.mxu1 }
 0x317   : > { %v2609_v2 = vpop.f32.mrf.mxu0 }
 0x31a   : > { %v4486_v33 = vpop.f32.mrf.mxu1 }
 0x31b   : > { %v4518_v39 = vpop.f32.mrf.mxu0  ;;  %v2487_v15 = vadd.f32 %v4486_v33, %v2331_v55 }
 0x31c   : > { %v2463_v36 = vpop.f32.mrf.mxu1 }
 0x31d   : > { %v2619_v43 = vpop.f32.mrf.mxu0  ;;  %v2486_v4 = vadd.f32 %v2463_v36, %v2330_v63  ;;  %v2643_v17 = vadd.f32 %v4518_v39, %v2487_v15 }
 0x31f   : > { %v2642_v33 = vadd.f32 %v2619_v43, %v2486_v4 }
 0x320   : > { %v4489_v40 = vpop.f32.mrf.mxu1 }
 0x321   : > { %v5641_v46 = vpop.f32.mrf.mxu0  ;;  %v2489_v20 = vadd.f32 %v4489_v40, %v2333_v3 }
 0x322   : > { %v2473_v56 = vpop.f32.mrf.mxu1  ;;  %5864 = vst [vmem:[#allocation9_spill] sm:$0xff] %v5641_v46  ;;  %v2172_v46 = vadd.f32 %v2141_v6, %v1994_v37 }
 0x323   : > { %v5643_v25 = vpop.f32.mrf.mxu0 }
 0x324   : > { %5865 = vst [vmem:[#allocation10_spill] sm:$0xff] %v5643_v25  ;;  %v2329_v25 = vadd.f32 %v4451_v13, %v2173_v41  ;;  %v2328_v59 = vadd.f32 %v2297_v14, %v2172_v46 }
 0x326   : > { %v2485_v10 = vadd.f32 %v4483_v28, %v2329_v25  ;;  %v2484_v6 = vadd.f32 %v2453_v30, %v2328_v59  ;;  %v2332_v28 = vadd.f32 %v5868_v27, %v2176_v0 }
 0x328   : > { %v2641_v21 = vadd.f32 %v4515_v23, %v2485_v10  ;;  %v2640_v5 = vadd.f32 %v2609_v2, %v2484_v6  ;;  %v2488_v8 = vadd.f32 %v2473_v56, %v2332_v28 }
 0x329   : > { %v5869_v48 = vld [vmem:[#allocation9_spill] sm:$0xff] }
 0x32a   : > { %v4544_v47 = vpop.f32.mrf.mxu1  ;;  %v2645_v49 = vadd.f32 %v5869_v48, %v2489_v20 }
 0x32b   : > { %v4576_v31 = vpop.f32.mrf.mxu0  ;;  %v2796_v22 = vadd.f32 %v4544_v47, %v2639_v60  ;;  %v5870_v38 = vld [vmem:[#allocation10_spill] sm:$0xff] }
 0x32c   : > { %v2756_v57 = vpop.f32.mrf.mxu1 }
 0x32d   : > { %v2912_v44 = vpop.f32.mrf.mxu0  ;;  %v2795_v1 = vadd.f32 %v2756_v57, %v2638_v11  ;;  %v2952_v19 = vadd.f32 %v4576_v31, %v2796_v22 }
 0x32e   : > { %v4547_v58 = vpop.f32.mrf.mxu1 }
 0x32f   : > { %v4579_v26 = vpop.f32.mrf.mxu0  ;;  %v2798_v24 = vadd.f32 %v4547_v58, %v2641_v21  ;;  %v2951_v18 = vadd.f32 %v2912_v44, %v2795_v1 }
 0x330   : > { %v2766_v35 = vpop.f32.mrf.mxu1 }
 0x331   : > { %v2922_v13 = vpop.f32.mrf.mxu0  ;;  %v2797_v30 = vadd.f32 %v2766_v35, %v2640_v5  ;;  %v2954_v2 = vadd.f32 %v4579_v26, %v2798_v24  ;;  %v2644_v35 = vadd.f32 %v5870_v38, %v2488_v8 }
 0x332   : > { %v4550_v45 = vpop.f32.mrf.mxu1 }
 0x333   : > { %v4582_v46 = vpop.f32.mrf.mxu0  ;;  %v2800_v36 = vadd.f32 %v4550_v45, %v2643_v17  ;;  %v2953_v31 = vadd.f32 %v2922_v13, %v2797_v30 }
 0x334   : > { %v2776_v51 = vpop.f32.mrf.mxu1 }
 0x335   : > { %v2799_v39 = vadd.f32 %v2776_v51, %v2642_v33  ;;  %v2932_v40 = vpop.f32.mrf.mxu0  ;;  %v2956_v41 = vadd.f32 %v4582_v46, %v2800_v36 }
 0x336   : > { %v4553_v12 = vpop.f32.mrf.mxu1 }
 0x337   : > { %v4585_v43 = vpop.f32.mrf.mxu0  ;;  %v2802_v42 = vadd.f32 %v4553_v12, %v2645_v49  ;;  %v2955_v52 = vadd.f32 %v2932_v40, %v2799_v39 }
 0x338   : > { %v2786_v14 = vpop.f32.mrf.mxu1 }
 0x339   : > { %v2801_v53 = vadd.f32 %v2786_v14, %v2644_v35  ;;  %v2942_v60 = vpop.f32.mrf.mxu0  ;;  %v2958_v61 = vadd.f32 %v4585_v43, %v2802_v42 }
 0x33b   : > { %v2957_v12 = vadd.f32 %v2942_v60, %v2801_v53 }
 0x340   : > { %v4608_v29 = vpop.f32.mrf.mxu1 }
 0x341   : > { %v3108_v23 = vadd.f32 %v4608_v29, %v2952_v19 }
 0x342   : > { %v3068_v47 = vpop.f32.mrf.mxu1 }
 0x343   : > { %v3123_v57 = vadd.f32 %v3848_v16, %v3108_v23  ;;  %v3107_v25 = vadd.f32 %v3068_v47, %v2951_v18 }
 0x344   : > { %v4611_v58 = vpop.f32.mrf.mxu1 }
 0x345   : > { %v3131_v32 = vmax.f32 %v3123_v57, 0.0  ;;  %v3122_v34 = vadd.f32 %v3848_v16, %v3107_v25  ;;  %v3110_v37 = vadd.f32 %v4611_v58, %v2954_v2 }
 0x346   : > { %v3078_v56 = vpop.f32.mrf.mxu1 }
 0x347   : > { %3140 = vst.msk [vmem:[#allocation4 + $0x8] sm:$0xff] %vm3138_vm6, %v3131_v32  ;;  %v3130_v44 = vmax.f32 %v3122_v34, 0.0  ;;  %v3125_v45 = vadd.f32 %v3848_v16, %v3110_v37  ;;  %v3109_v50 = vadd.f32 %v3078_v56, %v2953_v31 }
 0x348   : > { %v4614_v51 = vpop.f32.mrf.mxu1 }
 0x349   : > { %3139 = vst.msk [vmem:[#allocation4] sm:$0xff] %vm3138_vm6, %v3130_v44  ;;  %v3133_v7 = vmax.f32 %v3125_v45, 0.0  ;;  %v3124_v26 = vadd.f32 %v3848_v16, %v3109_v50  ;;  %v3112_v59 = vadd.f32 %v4614_v51, %v2956_v41 }
 0x34a   : > { %v3088_v10 = vpop.f32.mrf.mxu1 }
 0x34b   : > { %3142 = vst.msk [vmem:[#allocation4 + $0x18] sm:$0xff] %vm3138_vm6, %v3133_v7  ;;  %v3132_v54 = vmax.f32 %v3124_v26, 0.0  ;;  %v3127_v9 = vadd.f32 %v3848_v16, %v3112_v59  ;;  %v3111_v55 = vadd.f32 %v3088_v10, %v2955_v52 }
 0x34c   : > { %v4617_v62 = vpop.f32.mrf.mxu1 }
 0x34d   : > { %3141 = vst.msk [vmem:[#allocation4 + $0x10] sm:$0xff] %vm3138_vm6, %v3132_v54  ;;  %v3135_v11 = vmax.f32 %v3127_v9, 0.0  ;;  %v3126_v6 = vadd.f32 %v3848_v16, %v3111_v55  ;;  %v3114_v22 = vadd.f32 %v4617_v62, %v2958_v61 }
 0x34e   : > { %v3098_v63 = vpop.f32.mrf.mxu1  ;;  %v5657_v0 = vld [vmem:[#allocation4 + $0x8] sm:$0xff] }
 0x34f   : > { %3144 = vst.msk [vmem:[#allocation4 + $0x28] sm:$0xff] %vm3138_vm6, %v3135_v11  ;;  %v3134_v15 = vmax.f32 %v3126_v6, 0.0  ;;  %v3129_v13 = vadd.f32 %v3848_v16, %v3114_v22  ;;  %v3113_v21 = vadd.f32 %v3098_v63, %v2957_v12  ;;  %3222 = vrot.lane.b32.xlu1 %v5657_v0, %s4643_s25 }
 0x350   : > { %v5662_v1 = vld [vmem:[#allocation4] sm:$0xff] }
 0x351   : > { %3143 = vst.msk [vmem:[#allocation4 + $0x20] sm:$0xff] %vm3138_vm6, %v3134_v15  ;;  %v3137_v3 = vmax.f32 %v3129_v13, 0.0  ;;  %v3128_v4 = vadd.f32 %v3848_v16, %v3113_v21  ;;  %3220 = vrot.lane.b32.xlu0 %v5662_v1, %s4643_s25 }
 0x352   : > { %v5681_v5 = vld [vmem:[#allocation4 + $0x18] sm:$0xff] }
 0x353   : > { %3146 = vst.msk [vmem:[#allocation4 + $0x38] sm:$0xff] %vm3138_vm6, %v3137_v3  ;;  %v3136_v14 = vmax.f32 %v3128_v4, 0.0  ;;  %3311 = vrot.lane.b32.xlu1 %v5657_v0, %s4643_s25 }
 0x354   : > { %v5685_v19 = vld [vmem:[#allocation4 + $0x10] sm:$0xff] }
 0x355   : > { %3145 = vst.msk [vmem:[#allocation4 + $0x30] sm:$0xff] %vm3138_vm6, %v3136_v14  ;;  %3309 = vrot.lane.b32.xlu0 %v5662_v1, %s4643_s25 }
 0x356   : > { %v5697_v24 = vld [vmem:[#allocation4 + $0x28] sm:$0xff] }
 0x357   : > { %3400 = vrot.lane.b32.xlu1 %v5657_v0, %s4643_s25 }
 0x358   : > { %v5701_v27 = vld [vmem:[#allocation4 + $0x20] sm:$0xff] }
 0x359   : > { %3398 = vrot.lane.b32.xlu0 %v5662_v1, %s4643_s25 }
 0x35a   : > { %v5713_v28 = vld [vmem:[#allocation4 + $0x38] sm:$0xff] }
 0x35b   : > { %3165 = vrot.lane.b32.xlu1 %v5657_v0, %s4643_s25 }
 0x35c   : > { %v5717_v17 = vld [vmem:[#allocation4 + $0x30] sm:$0xff] }
 0x35d   : > { %3163 = vrot.lane.b32.xlu0 %v5662_v1, %s4643_s25 }
 0x35f   : > { %3226 = vrot.lane.b32.xlu1 %v5681_v5, %s4643_s25 }
 0x361   : > { %3224 = vrot.lane.b32.xlu0 %v5685_v19, %s4643_s25 }
 0x363   : > { %3315 = vrot.lane.b32.xlu1 %v5681_v5, %s4643_s25 }
 0x365   : > { %3313 = vrot.lane.b32.xlu0 %v5685_v19, %s4643_s25 }
 0x367   : > { %3404 = vrot.lane.b32.xlu1 %v5681_v5, %s4643_s25 }
 0x369   : > { %3402 = vrot.lane.b32.xlu0 %v5685_v19, %s4643_s25 }
 0x36b   : > { %3230 = vrot.lane.b32.xlu1 %v5697_v24, %s4643_s25 }
 0x36d   : > { %3228 = vrot.lane.b32.xlu0 %v5701_v27, %s4643_s25 }
 0x36f   : > { %3319 = vrot.lane.b32.xlu1 %v5697_v24, %s4643_s25 }
 0x371   : > { %3317 = vrot.lane.b32.xlu0 %v5701_v27, %s4643_s25 }
 0x373   : > { %3408 = vrot.lane.b32.xlu1 %v5697_v24, %s4643_s25 }
 0x375   : > { %3406 = vrot.lane.b32.xlu0 %v5701_v27, %s4643_s25 }
 0x377   : > { %3234 = vrot.lane.b32.xlu1 %v5713_v28, %s4643_s25 }
 0x379   : > { %3232 = vrot.lane.b32.xlu0 %v5717_v17, %s4643_s25 }
 0x37b   : > { %3323 = vrot.lane.b32.xlu1 %v5713_v28, %s4643_s25 }
 0x37d   : > { %3321 = vrot.lane.b32.xlu0 %v5717_v17, %s4643_s25 }
 0x37f   : > { %3412 = vrot.lane.b32.xlu1 %v5713_v28, %s4643_s25 }
 0x381   : > { %3410 = vrot.lane.b32.xlu0 %v5717_v17, %s4643_s25 }
 0x383   : > { %3169 = vrot.lane.b32.xlu1 %v5681_v5, %s4643_s25 }
 0x385   : > { %3167 = vrot.lane.b32.xlu0 %v5685_v19, %s4643_s25 }
 0x387   : > { %3173 = vrot.lane.b32.xlu1 %v5697_v24, %s4643_s25 }
 0x389   : > { %3171 = vrot.lane.b32.xlu0 %v5701_v27, %s4643_s25 }
 0x38b   : > { %3177 = vrot.lane.b32.xlu1 %v5713_v28, %s4643_s25 }
 0x38d   : > { %3175 = vrot.lane.b32.xlu0 %v5717_v17, %s4643_s25 }
 0x3c1   : > { %v3223_v20 = vpop.permute.xlu1 %3222 }
 0x3c2   : > { %v3245_v46 = vmax.f32 %v5657_v0, %v3223_v20 }
 0x3c3   : > { %v3221_v29 = vpop.permute.xlu0 %3220 }
 0x3c4   : > { %v3244_v16 = vmax.f32 %v5662_v1, %v3221_v29  ;;  %3262 = vrot.lane.b32.xlu1 %v3245_v46, %s4643_s25 }
 0x3c5   : > { %v3312_v18 = vpop.permute.xlu1 %3311 }
 0x3c6   : > { %v3334_v30 = vmax.f32 %v5657_v0, %v3312_v18  ;;  %3260 = vrot.lane.b32.xlu0 %v3244_v16, %s4643_s25 }
 0x3c7   : > { %v3310_v23 = vpop.permute.xlu0 %3309 }
 0x3c8   : > { %v3333_v33 = vmax.f32 %v5662_v1, %v3310_v23  ;;  %3351 = vrot.lane.b32.xlu1 %v3334_v30, %s4644_s26 }
 0x3c9   : > { %v3401_v8 = vpop.permute.xlu1 %3400 }
 0x3ca   : > { %v3423_v36 = vmax.f32 %v5657_v0, %v3401_v8  ;;  %3349 = vrot.lane.b32.xlu0 %v3333_v33, %s4644_s26 }
 0x3cb   : > { %v3399_v47 = vpop.permute.xlu0 %3398 }
 0x3cc   : > { %v3422_v2 = vmax.f32 %v5662_v1, %v3399_v47  ;;  %3440 = vrot.lane.b32.xlu1 %v3423_v36, %s4645_s27 }
 0x3cd   : > { %v3166_v57 = vpop.permute.xlu1 %3165 }
 0x3ce   : > { %v3188_v25 = vmax.f32 %v5657_v0, %v3166_v57  ;;  %3438 = vrot.lane.b32.xlu0 %v3422_v2, %s4645_s27 }
 0x3cf   : > { %v3164_v48 = vpop.permute.xlu0 %3163 }
 0x3d0   : > { %3197 = vst.msk [vmem:[#allocation5 + $0x8] sm:$0xff] %vm3195_vm7, %v3188_v25  ;;  %v3187_v49 = vmax.f32 %v5662_v1, %v3164_v48 }
 0x3d1   : > { %v3227_v39 = vpop.permute.xlu1 %3226 }
 0x3d2   : > { %3196 = vst.msk [vmem:[#allocation5] sm:$0xff] %vm3195_vm7, %v3187_v49  ;;  %v3247_v40 = vmax.f32 %v5681_v5, %v3227_v39 }
 0x3d3   : > { %v3225_v58 = vpop.permute.xlu0 %3224 }
 0x3d4   : > { %v3246_v31 = vmax.f32 %v5685_v19, %v3225_v58  ;;  %3266 = vrot.lane.b32.xlu1 %v3247_v40, %s4643_s25 }
 0x3d5   : > { %v3316_v32 = vpop.permute.xlu1 %3315 }
 0x3d6   : > { %v3336_v34 = vmax.f32 %v5681_v5, %v3316_v32  ;;  %3264 = vrot.lane.b32.xlu0 %v3246_v31, %s4643_s25 }
 0x3d7   : > { %v3314_v37 = vpop.permute.xlu0 %3313 }
 0x3d8   : > { %v3335_v38 = vmax.f32 %v5685_v19, %v3314_v37  ;;  %3355 = vrot.lane.b32.xlu1 %v3336_v34, %s4644_s26 }
 0x3d9   : > { %v3405_v35 = vpop.permute.xlu1 %3404 }
 0x3da   : > { %v3425_v41 = vmax.f32 %v5681_v5, %v3405_v35  ;;  %3353 = vrot.lane.b32.xlu0 %v3335_v38, %s4644_s26 }
 0x3db   : > { %v3403_v43 = vpop.permute.xlu0 %3402 }
 0x3dc   : > { %v3424_v56 = vmax.f32 %v5685_v19, %v3403_v43  ;;  %3444 = vrot.lane.b32.xlu1 %v3425_v41, %s4645_s27 }
 0x3dd   : > { %v3231_v42 = vpop.permute.xlu1 %3230 }
 0x3de   : > { %v3249_v44 = vmax.f32 %v5697_v24, %v3231_v42  ;;  %3442 = vrot.lane.b32.xlu0 %v3424_v56, %s4645_s27 }
 0x3df   : > { %v3229_v45 = vpop.permute.xlu0 %3228 }
 0x3e0   : > { %v3248_v50 = vmax.f32 %v5701_v27, %v3229_v45  ;;  %3270 = vrot.lane.b32.xlu1 %v3249_v44, %s4643_s25 }
 0x3e1   : > { %v3320_v52 = vpop.permute.xlu1 %3319 }
 0x3e2   : > { %v3338_v51 = vmax.f32 %v5697_v24, %v3320_v52  ;;  %3268 = vrot.lane.b32.xlu0 %v3248_v50, %s4643_s25 }
 0x3e3   : > { %v3318_v53 = vpop.permute.xlu0 %3317 }
 0x3e4   : > { %v3337_v7 = vmax.f32 %v5701_v27, %v3318_v53  ;;  %3359 = vrot.lane.b32.xlu1 %v3338_v51, %s4644_s26 }
 0x3e5   : > { %v3409_v26 = vpop.permute.xlu1 %3408 }
 0x3e6   : > { %v3427_v59 = vmax.f32 %v5697_v24, %v3409_v26  ;;  %3357 = vrot.lane.b32.xlu0 %v3337_v7, %s4644_s26 }
 0x3e7   : > { %v3407_v60 = vpop.permute.xlu0 %3406 }
 0x3e8   : > { %v3426_v10 = vmax.f32 %v5701_v27, %v3407_v60  ;;  %3448 = vrot.lane.b32.xlu1 %v3427_v59, %s4645_s27 }
 0x3e9   : > { %v3235_v61 = vpop.permute.xlu1 %3234 }
 0x3ea   : > { %v3251_v54 = vmax.f32 %v5713_v28, %v3235_v61  ;;  %3446 = vrot.lane.b32.xlu0 %v3426_v10, %s4645_s27 }
 0x3eb   : > { %v3233_v9 = vpop.permute.xlu0 %3232 }
 0x3ec   : > { %v3250_v55 = vmax.f32 %v5717_v17, %v3233_v9  ;;  %3274 = vrot.lane.b32.xlu1 %v3251_v54, %s4643_s25 }
 0x3ed   : > { %v3324_v62 = vpop.permute.xlu1 %3323 }
 0x3ee   : > { %v3340_v12 = vmax.f32 %v5713_v28, %v3324_v62  ;;  %3272 = vrot.lane.b32.xlu0 %v3250_v55, %s4643_s25 }
 0x3ef   : > { %v3322_v11 = vpop.permute.xlu0 %3321 }
 0x3f0   : > { %v3339_v6 = vmax.f32 %v5717_v17, %v3322_v11  ;;  %3363 = vrot.lane.b32.xlu1 %v3340_v12, %s4644_s26 }
 0x3f1   : > { %v3413_v22 = vpop.permute.xlu1 %3412 }
 0x3f2   : > { %v3429_v63 = vmax.f32 %v5713_v28, %v3413_v22  ;;  %3361 = vrot.lane.b32.xlu0 %v3339_v6, %s4644_s26 }
 0x3f3   : > { %v3411_v0 = vpop.permute.xlu0 %3410 }
 0x3f4   : > { %v3428_v15 = vmax.f32 %v5717_v17, %v3411_v0  ;;  %3452 = vrot.lane.b32.xlu1 %v3429_v63, %s4645_s27 }
 0x3f5   : > { %v3170_v13 = vpop.permute.xlu1 %3169 }
 0x3f6   : > { %v3190_v21 = vmax.f32 %v5681_v5, %v3170_v13  ;;  %3450 = vrot.lane.b32.xlu0 %v3428_v15, %s4645_s27 }
 0x3f7   : > { %v3168_v1 = vpop.permute.xlu0 %3167 }
 0x3f8   : > { %3199 = vst.msk [vmem:[#allocation5 + $0x18] sm:$0xff] %vm3195_vm7, %v3190_v21  ;;  %v3189_v3 = vmax.f32 %v5685_v19, %v3168_v1 }
 0x3f9   : > { %v3174_v4 = vpop.permute.xlu1 %3173 }
 0x3fa   : > { %3198 = vst.msk [vmem:[#allocation5 + $0x10] sm:$0xff] %vm3195_vm7, %v3189_v3  ;;  %v3192_v14 = vmax.f32 %v5697_v24, %v3174_v4 }
 0x3fb   : > { %v3172_v20 = vpop.permute.xlu0 %3171 }
 0x3fc   : > { %3201 = vst.msk [vmem:[#allocation5 + $0x28] sm:$0xff] %vm3195_vm7, %v3192_v14  ;;  %v3191_v46 = vmax.f32 %v5701_v27, %v3172_v20 }
 0x3fd   : > { %v3178_v29 = vpop.permute.xlu1 %3177 }
 0x3fe   : > { %3200 = vst.msk [vmem:[#allocation5 + $0x20] sm:$0xff] %vm3195_vm7, %v3191_v46  ;;  %v3194_v5 = vmax.f32 %v5713_v28, %v3178_v29 }
 0x3ff   : > { %v3176_v16 = vpop.permute.xlu0 %3175 }
 0x400   : > { %3203 = vst.msk [vmem:[#allocation5 + $0x38] sm:$0xff] %vm3195_vm7, %v3194_v5  ;;  %v3193_v19 = vmax.f32 %v5717_v17, %v3176_v16 }
 0x402   : > { %3202 = vst.msk [vmem:[#allocation5 + $0x30] sm:$0xff] %vm3195_vm7, %v3193_v19 }
 0x436   : > { %v3263_v18 = vpop.permute.xlu1 %3262 }
 0x437   : > { %3286 = vst.msk [vmem:[#allocation5 + $0x8] sm:$0xff] %vm3284_vm8, %v3263_v18 }
 0x438   : > { %v3261_v24 = vpop.permute.xlu0 %3260 }
 0x439   : > { %3285 = vst.msk [vmem:[#allocation5] sm:$0xff] %vm3284_vm8, %v3261_v24 }
 0x43a   : > { %v3352_v27 = vpop.permute.xlu1 %3351 }
 0x43b   : > { %3375 = vst.msk [vmem:[#allocation5 + $0x8] sm:$0xff] %vm3373_vm9, %v3352_v27 }
 0x43c   : > { %v3350_v28 = vpop.permute.xlu0 %3349 }
 0x43d   : > { %3374 = vst.msk [vmem:[#allocation5] sm:$0xff] %vm3373_vm9, %v3350_v28 }
 0x43e   : > { %v3441_v30 = vpop.permute.xlu1 %3440 }
 0x43f   : > { %3464 = vst.msk [vmem:[#allocation5 + $0x8] sm:$0xff] %vm3462_vm10, %v3441_v30 }
 0x440   : > { %v3439_v17 = vpop.permute.xlu0 %3438 }
 0x441   : > { %3463 = vst.msk [vmem:[#allocation5] sm:$0xff] %vm3462_vm10, %v3439_v17 }
 0x446   : > { %v3473_v23 = vld [vmem:[#allocation5 + $0x8] ss:$2 sm:$0xf]  ;;  %v3489_v33 = vld [vmem:[#allocation5 + $0x9] ss:$2 sm:$0xf]  ;;  %v3267_v8 = vpop.permute.xlu1 %3266 }
 0x447   : > { %3288 = vst.msk [vmem:[#allocation5 + $0x18] sm:$0xff] %vm3284_vm8, %v3267_v8  ;;  %v3503_v57 = vmax.f32 %v3473_v23, %v3489_v33 }
 0x448   : > { %v3471_v36 = vld [vmem:[#allocation5] ss:$2 sm:$0xf]  ;;  %v3487_v47 = vld [vmem:[#allocation5 + $0x1] ss:$2 sm:$0xf]  ;;  %v3265_v2 = vpop.permute.xlu0 %3264 }
 0x449   : > { %v3502_v25 = vmax.f32 %v3471_v36, %v3487_v47  ;;  %3287 = vst.msk [vmem:[#allocation5 + $0x10] sm:$0xff] %vm3284_vm8, %v3265_v2 }
 0x44a   : > { %v3356_v48 = vpop.permute.xlu1 %3355 }
 0x44b   : > { %v3510_v49 = vmax.f32 %v3502_v25, %v3503_v57  ;;  %3377 = vst.msk [vmem:[#allocation5 + $0x18] sm:$0xff] %vm3373_vm9, %v3356_v48 }
 0x44c   : > { %v3354_v39 = vpop.permute.xlu0 %3353 }
 0x44d   : > { %3515 = vst.msk [vmem:[%s5817_s6] sm:$0xf] %vm3514_vm11, %v3510_v49 }
 0x44e   : > { %3376 = vst.msk [vmem:[#allocation5 + $0x10] sm:$0xff] %vm3373_vm9, %v3354_v39  ;;  %v3445_v40 = vpop.permute.xlu1 %3444 }
 0x44f   : > { %3466 = vst.msk [vmem:[#allocation5 + $0x18] sm:$0xff] %vm3462_vm10, %v3445_v40 }
 0x450   : > { %v3443_v58 = vpop.permute.xlu0 %3442 }
 0x451   : > { %3465 = vst.msk [vmem:[#allocation5 + $0x10] sm:$0xff] %vm3462_vm10, %v3443_v58 }
 0x452   : > { %v3271_v31 = vpop.permute.xlu1 %3270 }
 0x453   : > { %3290 = vst.msk [vmem:[#allocation5 + $0x28] sm:$0xff] %vm3284_vm8, %v3271_v31 }
 0x454   : > { %v3269_v32 = vpop.permute.xlu0 %3268 }
 0x455   : > { %3289 = vst.msk [vmem:[#allocation5 + $0x20] sm:$0xff] %vm3284_vm8, %v3269_v32 }
 0x456   : > { %v3477_v34 = vld [vmem:[#allocation5 + $0x18] ss:$2 sm:$0xf]  ;;  %v3493_v37 = vld [vmem:[#allocation5 + $0x19] ss:$2 sm:$0xf]  ;;  %v3360_v38 = vpop.permute.xlu1 %3359 }
 0x457   : > { %3379 = vst.msk [vmem:[#allocation5 + $0x28] sm:$0xff] %vm3373_vm9, %v3360_v38  ;;  %v3505_v56 = vmax.f32 %v3477_v34, %v3493_v37 }
 0x458   : > { %v3475_v35 = vld [vmem:[#allocation5 + $0x10] ss:$2 sm:$0xf]  ;;  %v3491_v41 = vld [vmem:[#allocation5 + $0x11] ss:$2 sm:$0xf]  ;;  %v3358_v43 = vpop.permute.xlu0 %3357 }
 0x459   : > { %v3504_v42 = vmax.f32 %v3475_v35, %v3491_v41  ;;  %3378 = vst.msk [vmem:[#allocation5 + $0x20] sm:$0xff] %vm3373_vm9, %v3358_v43 }
 0x45a   : > { %v3449_v44 = vpop.permute.xlu1 %3448 }
 0x45b   : > { %v3511_v45 = vmax.f32 %v3504_v42, %v3505_v56  ;;  %3468 = vst.msk [vmem:[#allocation5 + $0x28] sm:$0xff] %vm3462_vm10, %v3449_v44 }
 0x45c   : > { %v3447_v50 = vpop.permute.xlu0 %3446 }
 0x45d   : > { %3516 = vst.msk [vmem:[%s5817_s6 + $0x4] sm:$0xf] %vm3514_vm11, %v3511_v45 }
 0x45e   : > { %3467 = vst.msk [vmem:[#allocation5 + $0x20] sm:$0xff] %vm3462_vm10, %v3447_v50  ;;  %v3275_v52 = vpop.permute.xlu1 %3274 }
 0x45f   : > { %3292 = vst.msk [vmem:[#allocation5 + $0x38] sm:$0xff] %vm3284_vm8, %v3275_v52 }
 0x460   : > { %v3273_v51 = vpop.permute.xlu0 %3272 }
 0x461   : > { %3291 = vst.msk [vmem:[#allocation5 + $0x30] sm:$0xff] %vm3284_vm8, %v3273_v51 }
 0x462   : > { %v3481_v53 = vld [vmem:[#allocation5 + $0x28] ss:$2 sm:$0xf]  ;;  %v3497_v7 = vld [vmem:[#allocation5 + $0x29] ss:$2 sm:$0xf]  ;;  %v3364_v26 = vpop.permute.xlu1 %3363 }
 0x463   : > { %3381 = vst.msk [vmem:[#allocation5 + $0x38] sm:$0xff] %vm3373_vm9, %v3364_v26  ;;  %v3507_v61 = vmax.f32 %v3481_v53, %v3497_v7 }
 0x464   : > { %v3362_v10 = vpop.permute.xlu0 %3361 }
 0x465   : > { %v3479_v59 = vld [vmem:[#allocation5 + $0x20] ss:$2 sm:$0xf]  ;;  %v3495_v60 = vld [vmem:[#allocation5 + $0x21] ss:$2 sm:$0xf] }
 0x466   : > { %v3506_v54 = vmax.f32 %v3479_v59, %v3495_v60  ;;  %3380 = vst.msk [vmem:[#allocation5 + $0x30] sm:$0xff] %vm3373_vm9, %v3362_v10  ;;  %v3453_v9 = vpop.permute.xlu1 %3452 }
 0x467   : > { %3470 = vst.msk [vmem:[#allocation5 + $0x38] sm:$0xff] %vm3462_vm10, %v3453_v9 }
 0x468   : > { %v3512_v55 = vmax.f32 %v3506_v54, %v3507_v61  ;;  %v3451_v62 = vpop.permute.xlu0 %3450 }
 0x469   : > { %3469 = vst.msk [vmem:[#allocation5 + $0x30] sm:$0xff] %vm3462_vm10, %v3451_v62 }
 0x46a   : > { %3517 = vst.msk [vmem:[%s5817_s6 + $0x8] sm:$0xf] %vm3514_vm11, %v3512_v55 }
 0x46e   : > { %v3485_v12 = vld [vmem:[#allocation5 + $0x38] ss:$2 sm:$0xf]  ;;  %v3501_v11 = vld [vmem:[#allocation5 + $0x39] ss:$2 sm:$0xf] }
 0x46f   : > { %v3509_v63 = vmax.f32 %v3485_v12, %v3501_v11 }
 0x470   : > { %v3483_v6 = vld [vmem:[#allocation5 + $0x30] ss:$2 sm:$0xf]  ;;  %v3499_v22 = vld [vmem:[#allocation5 + $0x31] ss:$2 sm:$0xf] }
 0x471   : > { %v3508_v0 = vmax.f32 %v3483_v6, %v3499_v22 }
 0x473   : > { %v3513_v15 = vmax.f32 %v3508_v0, %v3509_v63 }
 0x475   : > { %3518 = vst.msk [vmem:[%s5817_s6 + $0xc] sm:$0xf] %vm3514_vm11, %v3513_v15 }
 0x476 PF: > { %s15_s18 = sadd.s32 1, %s4638_s18  }
 0x477   : > { %p12_p4 = scmp.ge.s32.totalorder %s15_s18, 4  }
 0x479   :  { %14 = sbr.rel (!%p12_p4) target bundleno = 1 (0x1), region = 105 }

</bundles_post_ra>
